<compile_context>
chip_gen: v5e
topology: v5e:2x2
jax: 0.10.0
libtpu: 0.0.40
codegen_flags: <defaults>
</compile_context>

<pallas_src>
import math

import jax
import jax.numpy as jnp
from jax.experimental import pallas as pl
from jax.experimental.pallas import tpu as pltpu


def _fast_attention_kernel(q_ref, k_ref, v_ref, projt_ref, o_ref):
    # q_ref/k_ref/v_ref: (1, N, D)  one (batch*head) slice
    # projt_ref:         (D, M)     projection matrix, pre-transposed (lane-dense M)
    # o_ref:             (1, N, D)
    _, n, d = q_ref.shape
    m = projt_ref.shape[-1]
    data_normalizer = float(d) ** -0.25
    ratio = float(m) ** -0.5
    kernel_eps = 1e-4

    q = q_ref[0]
    k = k_ref[0]
    v = v_ref[0].astype(jnp.float32)
    projt = projt_ref[...]

    # ---- softmax_kernel feature maps (FAVOR+) --------------------------------
    # data_dash = (data_normalizer * data) @ projection^T  (MXU, f32 accumulate)
    q_dash = jnp.dot(q * data_normalizer, projt,
                     preferred_element_type=jnp.float32)                     # (N, M)
    k_dash = jnp.dot(k * data_normalizer, projt,
                     preferred_element_type=jnp.float32)                     # (N, M)

    qf = q.astype(jnp.float32)
    kf = k.astype(jnp.float32)
    half_dn2 = 0.5 * data_normalizer * data_normalizer
    q_diag = jnp.sum(qf * qf, axis=-1, keepdims=True) * half_dn2             # (N, 1)
    k_diag = jnp.sum(kf * kf, axis=-1, keepdims=True) * half_dn2             # (N, 1)

    # Query: per-row max stabilisation.  Key: per-head (global) max.
    q_max = jnp.max(q_dash, axis=-1, keepdims=True)                          # (N, 1)
    k_max = jnp.max(jnp.max(k_dash, axis=-1, keepdims=True),
                    axis=0, keepdims=True)                                   # (1, 1)
    q_feat = ratio * (jnp.exp(q_dash - q_diag - q_max) + kernel_eps)         # (N, M)
    k_feat = ratio * (jnp.exp(k_dash - k_diag - k_max) + kernel_eps)         # (N, M)

    # ---- non-causal linear attention -----------------------------------------
    k_sum = jnp.sum(k_feat, axis=0, keepdims=True)                           # (1, M)
    denom = jnp.sum(q_feat * k_sum, axis=-1, keepdims=True)                  # (N, 1)
    # context = k_feat^T @ v (contract over sequence axis)
    context = jnp.dot(k_feat.T, v, preferred_element_type=jnp.float32)       # (M, D)
    out = jnp.dot(q_feat, context, preferred_element_type=jnp.float32) / denom
    o_ref[0] = out.astype(o_ref.dtype)


def fast_attention(q, k, v, projection_matrix):
    """Non-causal Performer attention.

    q, k, v: (B, H, N, D); projection_matrix: (M, D) (rows = random features).
    Returns (B, H, N, D).
    """
    B, H, N, D = q.shape
    M = projection_matrix.shape[0]
    BH = B * H

    q2 = q.reshape(BH, N, D)
    k2 = k.reshape(BH, N, D)
    v2 = v.reshape(BH, N, D)
    projt = jnp.swapaxes(projection_matrix, 0, 1)   # (D, M), lane-dense feature axis

    itemsize = jnp.dtype(q.dtype).itemsize
    cost = pl.CostEstimate(
        flops=int(BH * (8 * N * M * D + 2 * N * M)),
        transcendentals=int(BH * 2 * N * M),
        bytes_accessed=int((4 * BH * N * D + D * M) * itemsize),
    )

    # TODO(synk): for very long sequences, tile N for the query pass and do a
    # two-pass reduction for the key-side global max / k_sum / context instead
    # of keeping the whole head resident.
    out = pl.pallas_call(
        _fast_attention_kernel,
        out_shape=jax.ShapeDtypeStruct((BH, N, D), q.dtype),
        grid_spec=pltpu.PrefetchScalarGridSpec(
            num_scalar_prefetch=0,
            grid=(BH,),
            in_specs=[
                pl.BlockSpec((1, N, D), lambda i: (i, 0, 0)),   # q slice
                pl.BlockSpec((1, N, D), lambda i: (i, 0, 0)),   # k slice
                pl.BlockSpec((1, N, D), lambda i: (i, 0, 0)),   # v slice
                pl.BlockSpec((D, M), lambda i: (0, 0)),         # projection (resident)
            ],
            out_specs=pl.BlockSpec((1, N, D), lambda i: (i, 0, 0)),
        ),
        compiler_params=pltpu.CompilerParams(
            dimension_semantics=("parallel",)),
        cost_estimate=cost,
    )(q2, k2, v2, projt)

    return out.reshape(B, H, N, D)


# ----------------------------- pure-JAX reference -----------------------------

def _softmax_kernel_ref(data, projection_matrix, is_query, eps=1e-4):
    d = data.shape[-1]
    m = projection_matrix.shape[0]
    data_normalizer = d ** -0.25
    ratio = m ** -0.5
    data_dash = jnp.einsum('...id,jd->...ij', data_normalizer * data,
                           projection_matrix,
                           precision=jax.lax.Precision.HIGHEST)
    diag_data = jnp.sum(data ** 2, axis=-1) / 2.0 * data_normalizer ** 2
    diag_data = diag_data[..., None]
    if is_query:
        stab = jnp.max(data_dash, axis=-1, keepdims=True)
    else:
        stab = jnp.max(data_dash, axis=(-1, -2), keepdims=True)
    return ratio * (jnp.exp(data_dash - diag_data - stab) + eps)


def _linear_attention_ref(q, k, v):
    k_cumsum = jnp.sum(k, axis=-2)
    d_inv = 1.0 / jnp.einsum('...nd,...d->...n', q, k_cumsum,
                             precision=jax.lax.Precision.HIGHEST)
    context = jnp.einsum('...nd,...ne->...de', k, v,
                         precision=jax.lax.Precision.HIGHEST)
    return jnp.einsum('...de,...nd,...n->...ne', context, q, d_inv,
                      precision=jax.lax.Precision.HIGHEST)


def _fast_attention_ref(q, k, v, projection_matrix):
    qp = _softmax_kernel_ref(q, projection_matrix, is_query=True)
    kp = _softmax_kernel_ref(k, projection_matrix, is_query=False)
    return _linear_attention_ref(qp, kp, v)


def _gaussian_orthogonal_random_matrix(key, nb_rows, nb_columns, scaling=0):
    """JAX port of the module's gaussian_orthogonal_random_matrix (QR-based)."""
    nb_full_blocks = nb_rows // nb_columns
    n_blocks = nb_full_blocks + (1 if nb_rows % nb_columns else 0)
    keys = jax.random.split(key, n_blocks + 1)
    blocks = []
    for i in range(n_blocks):
        unstructured = jax.random.normal(keys[i], (nb_columns, nb_columns),
                                         jnp.float32)
        qmat, _ = jnp.linalg.qr(unstructured)
        blocks.append(qmat.T)
    final_matrix = jnp.concatenate(blocks, axis=0)[:nb_rows]
    if scaling == 0:
        multiplier = jnp.linalg.norm(
            jax.random.normal(keys[-1], (nb_rows, nb_columns), jnp.float32),
            axis=1)
    elif scaling == 1:
        multiplier = math.sqrt(float(nb_columns)) * jnp.ones((nb_rows,),
                                                             jnp.float32)
    else:
        raise ValueError(f"Invalid scaling {scaling}")
    return multiplier[:, None] * final_matrix


if __name__ == "__main__":
    # Small shapes consistent with the module: dim_heads=32, batch=2, heads=4,
    # seq=128, nb_features=128 (chosen lane-dense; the module's default would
    # be int(32 * ln 32) = 110, and nb_features is a constructor parameter).
    B, H, N, D = 2, 4, 128, 32
    M = 128

    key = jax.random.PRNGKey(0)
    kq, kk, kv, kp = jax.random.split(key, 4)
    q = jax.random.normal(kq, (B, H, N, D), jnp.float32)
    k = jax.random.normal(kk, (B, H, N, D), jnp.float32)
    v = jax.random.normal(kv, (B, H, N, D), jnp.float32)
    projection_matrix = _gaussian_orthogonal_random_matrix(kp, M, D)

    # TODO(synk): causal=True (chunked prefix-sum / flash path),
    # generalized_attention=True and no_projection=True branches are not
    # implemented; the module defaults (non-causal softmax-kernel attention)
    # are implemented exactly.
    out = fast_attention(q, k, v, projection_matrix)
    jax.block_until_ready(out)

    ref = _fast_attention_ref(q, k, v, projection_matrix)
    assert out.shape == (B, H, N, D)
    max_err = float(jnp.max(jnp.abs(out - ref)))
    assert jnp.allclose(out, ref, atol=5e-3, rtol=5e-3), (
        f"mismatch vs reference, max abs err {max_err}")

    print("KERNEL_OK")
</pallas_src>

<mosaic_0001>
module attributes {stable_mosaic.version = 11 : i64} {
  func.func @_fast_attention_kernel(%arg0: i32, %arg1: memref<1x128x32xf32, #tpu.memory_space<vmem>>, %arg2: memref<1x128x32xf32, #tpu.memory_space<vmem>>, %arg3: memref<1x128x32xf32, #tpu.memory_space<vmem>>, %arg4: memref<32x128xf32, #tpu.memory_space<vmem>>, %arg5: memref<1x128x32xf32, #tpu.memory_space<vmem>>) attributes {dimension_semantics = [#tpu.dimension_semantics<parallel>], iteration_bounds = array<i64: 8>, scalar_prefetch = 0 : i64, scratch_operands = 0 : i64, tpu.core_type = #tpu.core_type<tc>, window_params = [{transform_indices = @transform_0, window_bounds = array<i64: 1, 128, 32>}, {transform_indices = @transform_1, window_bounds = array<i64: 1, 128, 32>}, {transform_indices = @transform_2, window_bounds = array<i64: 1, 128, 32>}, {pipeline_mode = #tpu.pipeline_mode<synchronous>, transform_indices = @transform_3, window_bounds = array<i64: 32, 128>}, {transform_indices = @transform_4, window_bounds = array<i64: 1, 128, 32>}]} {
    %c0 = arith.constant 0 : index
    %c0_0 = arith.constant 0 : index
    %c0_1 = arith.constant 0 : index
    %0 = vector.load %arg1[%c0, %c0_0, %c0_1] : memref<1x128x32xf32, #tpu.memory_space<vmem>>, vector<1x128x32xf32>
    %1 = vector.shape_cast %0 : vector<1x128x32xf32> to vector<128x32xf32>
    %c0_2 = arith.constant 0 : index
    %c0_3 = arith.constant 0 : index
    %c0_4 = arith.constant 0 : index
    %2 = vector.load %arg2[%c0_2, %c0_3, %c0_4] : memref<1x128x32xf32, #tpu.memory_space<vmem>>, vector<1x128x32xf32>
    %3 = vector.shape_cast %2 : vector<1x128x32xf32> to vector<128x32xf32>
    %c0_5 = arith.constant 0 : index
    %c0_6 = arith.constant 0 : index
    %c0_7 = arith.constant 0 : index
    %4 = vector.load %arg3[%c0_5, %c0_6, %c0_7] : memref<1x128x32xf32, #tpu.memory_space<vmem>>, vector<1x128x32xf32>
    %5 = vector.shape_cast %4 : vector<1x128x32xf32> to vector<128x32xf32>
    %c0_8 = arith.constant 0 : index
    %c0_9 = arith.constant 0 : index
    %6 = vector.load %arg4[%c0_8, %c0_9] : memref<32x128xf32, #tpu.memory_space<vmem>>, vector<32x128xf32>
    %cst = arith.constant 0.420448214 : f32
    %7 = vector.broadcast %cst : f32 to vector<128x32xf32>
    %8 = arith.mulf %1, %7 : vector<128x32xf32>
    %cst_10 = arith.constant dense<0.000000e+00> : vector<128x128xf32>
    %9 = tpu.matmul %8, %6, %cst_10 {dimension_numbers = #tpu.dot_dimension_numbers<[1], [0], [0], [1], [0, 0, 1, 1], [], []>} : vector<128x32xf32>, vector<32x128xf32>, vector<128x128xf32> -> vector<128x128xf32>
    %cst_11 = arith.constant 0.420448214 : f32
    %10 = vector.broadcast %cst_11 : f32 to vector<128x32xf32>
    %11 = arith.mulf %3, %10 : vector<128x32xf32>
    %cst_12 = arith.constant dense<0.000000e+00> : vector<128x128xf32>
    %12 = tpu.matmul %11, %6, %cst_12 {dimension_numbers = #tpu.dot_dimension_numbers<[1], [0], [0], [1], [0, 0, 1, 1], [], []>} : vector<128x32xf32>, vector<32x128xf32>, vector<128x128xf32> -> vector<128x128xf32>
    %13 = arith.mulf %1, %1 : vector<128x32xf32>
    %cst_13 = arith.constant dense<0.000000e+00> : vector<128xf32>
    %14 = vector.multi_reduction <add>, %13, %cst_13 [1] : vector<128x32xf32> to vector<128xf32>
    %15 = vector.shape_cast %14 : vector<128xf32> to vector<128x1xf32>
    %cst_14 = arith.constant 0.0883883461 : f32
    %16 = vector.broadcast %cst_14 : f32 to vector<128x1xf32>
    %17 = arith.mulf %15, %16 : vector<128x1xf32>
    %18 = arith.mulf %3, %3 : vector<128x32xf32>
    %cst_15 = arith.constant dense<0.000000e+00> : vector<128xf32>
    %19 = vector.multi_reduction <add>, %18, %cst_15 [1] : vector<128x32xf32> to vector<128xf32>
    %20 = vector.shape_cast %19 : vector<128xf32> to vector<128x1xf32>
    %cst_16 = arith.constant 0.0883883461 : f32
    %21 = vector.broadcast %cst_16 : f32 to vector<128x1xf32>
    %22 = arith.mulf %20, %21 : vector<128x1xf32>
    %cst_17 = arith.constant dense<0xFF800000> : vector<128xf32>
    %23 = vector.multi_reduction <maximumf>, %9, %cst_17 [1] : vector<128x128xf32> to vector<128xf32>
    %24 = vector.shape_cast %23 : vector<128xf32> to vector<128x1xf32>
    %cst_18 = arith.constant dense<0xFF800000> : vector<128xf32>
    %25 = vector.multi_reduction <maximumf>, %12, %cst_18 [1] : vector<128x128xf32> to vector<128xf32>
    %26 = vector.shape_cast %25 : vector<128xf32> to vector<128x1xf32>
    %cst_19 = arith.constant dense<0xFF800000> : vector<1xf32>
    %27 = vector.multi_reduction <maximumf>, %26, %cst_19 [0] : vector<128x1xf32> to vector<1xf32>
    %28 = vector.shape_cast %27 : vector<1xf32> to vector<1x1xf32>
    %29 = vector.broadcast %17 : vector<128x1xf32> to vector<128x128xf32>
    %30 = arith.subf %9, %29 : vector<128x128xf32>
    %31 = vector.broadcast %24 : vector<128x1xf32> to vector<128x128xf32>
    %32 = arith.subf %30, %31 : vector<128x128xf32>
    %33 = math.exp %32 : vector<128x128xf32>
    %cst_20 = arith.constant 9.99999974E-5 : f32
    %34 = vector.broadcast %cst_20 : f32 to vector<128x128xf32>
    %35 = arith.addf %33, %34 : vector<128x128xf32>
    %cst_21 = arith.constant 0.0883883461 : f32
    %36 = vector.broadcast %cst_21 : f32 to vector<128x128xf32>
    %37 = arith.mulf %36, %35 : vector<128x128xf32>
    %38 = vector.broadcast %22 : vector<128x1xf32> to vector<128x128xf32>
    %39 = arith.subf %12, %38 : vector<128x128xf32>
    %40 = vector.broadcast %28 : vector<1x1xf32> to vector<128x128xf32>
    %41 = arith.subf %39, %40 : vector<128x128xf32>
    %42 = math.exp %41 : vector<128x128xf32>
    %cst_22 = arith.constant 9.99999974E-5 : f32
    %43 = vector.broadcast %cst_22 : f32 to vector<128x128xf32>
    %44 = arith.addf %42, %43 : vector<128x128xf32>
    %cst_23 = arith.constant 0.0883883461 : f32
    %45 = vector.broadcast %cst_23 : f32 to vector<128x128xf32>
    %46 = arith.mulf %45, %44 : vector<128x128xf32>
    %cst_24 = arith.constant dense<0.000000e+00> : vector<128xf32>
    %47 = vector.multi_reduction <add>, %46, %cst_24 [0] : vector<128x128xf32> to vector<128xf32>
    %48 = vector.shape_cast %47 : vector<128xf32> to vector<1x128xf32>
    %49 = vector.broadcast %48 : vector<1x128xf32> to vector<128x128xf32>
    %50 = arith.mulf %37, %49 : vector<128x128xf32>
    %cst_25 = arith.constant dense<0.000000e+00> : vector<128xf32>
    %51 = vector.multi_reduction <add>, %50, %cst_25 [1] : vector<128x128xf32> to vector<128xf32>
    %52 = vector.shape_cast %51 : vector<128xf32> to vector<128x1xf32>
    %53 = tpu.transpose %46, [1, 0] : vector<128x128xf32> -> vector<128x128xf32>
    %cst_26 = arith.constant dense<0.000000e+00> : vector<128x32xf32>
    %54 = tpu.matmul %53, %5, %cst_26 {dimension_numbers = #tpu.dot_dimension_numbers<[1], [0], [0], [1], [0, 0, 1, 1], [], []>} : vector<128x128xf32>, vector<128x32xf32>, vector<128x32xf32> -> vector<128x32xf32>
    %cst_27 = arith.constant dense<0.000000e+00> : vector<128x32xf32>
    %55 = tpu.matmul %37, %54, %cst_27 {dimension_numbers = #tpu.dot_dimension_numbers<[1], [0], [0], [1], [0, 0, 1, 1], [], []>} : vector<128x128xf32>, vector<128x32xf32>, vector<128x32xf32> -> vector<128x32xf32>
    %56 = vector.broadcast %52 : vector<128x1xf32> to vector<128x32xf32>
    %57 = arith.divf %55, %56 : vector<128x32xf32>
    %c0_28 = arith.constant 0 : index
    %c0_29 = arith.constant 0 : index
    %c0_30 = arith.constant 0 : index
    %58 = vector.load %arg5[%c0_28, %c0_29, %c0_30] : memref<1x128x32xf32, #tpu.memory_space<vmem>>, vector<1x128x32xf32>
    %59 = vector.shape_cast %58 : vector<1x128x32xf32> to vector<128x32xf32>
    %60 = vector.shape_cast %57 : vector<128x32xf32> to vector<1x128x32xf32>
    tpu.vector_store %arg5[%c0_28, %c0_29, %c0_30], %60 {strides = array<i32>} : memref<1x128x32xf32, #tpu.memory_space<vmem>>, vector<1x128x32xf32>,
    return
  }
  func.func @transform_0(%arg0: i32) -> (i32, i32, i32) {
    %c0_i32 = arith.constant 0 : i32
    %c0_i32_0 = arith.constant 0 : i32
    %c0_i32_1 = arith.constant 0 : i32
    return %arg0, %c0_i32, %c0_i32_0 : i32, i32, i32
  }
  func.func @transform_1(%arg0: i32) -> (i32, i32, i32) {
    %c0_i32 = arith.constant 0 : i32
    %c0_i32_0 = arith.constant 0 : i32
    %c0_i32_1 = arith.constant 0 : i32
    return %arg0, %c0_i32, %c0_i32_0 : i32, i32, i32
  }
  func.func @transform_2(%arg0: i32) -> (i32, i32, i32) {
    %c0_i32 = arith.constant 0 : i32
    %c0_i32_0 = arith.constant 0 : i32
    %c0_i32_1 = arith.constant 0 : i32
    return %arg0, %c0_i32, %c0_i32_0 : i32, i32, i32
  }
  func.func @transform_3(%arg0: i32) -> (i32, i32) {
    %c0_i32 = arith.constant 0 : i32
    %c0_i32_0 = arith.constant 0 : i32
    %c0_i32_1 = arith.constant 0 : i32
    return %c0_i32, %c0_i32_0 : i32, i32
  }
  func.func @transform_4(%arg0: i32) -> (i32, i32, i32) {
    %c0_i32 = arith.constant 0 : i32
    %c0_i32_0 = arith.constant 0 : i32
    %c0_i32_1 = arith.constant 0 : i32
    return %arg0, %c0_i32, %c0_i32_0 : i32, i32, i32
  }
}

</mosaic_0001>

<bundles_post_ra>
// kernel: tpu_custom_call.1
= control target key start
LH: loop header
LB: loop body
LE: loop exit
PB: predicated region body
PF: predicated region fallthrough
CT: control target
= control target key end

     0   :  { %s1772_s15 = smov 0   ;;  %s2513_s0 = inlined_call_operand.vmem [shape: f32[8,128,32], index: 0, kind: input, shape index: {}]   ;;  %s2514_s1 = inlined_call_operand.vmem [shape: f32[8,128,32], index: 1, kind: input, shape index: {}]   ;;  %s2515_s2 = inlined_call_operand.vmem [shape: f32[8,128,32], index: 2, kind: input, shape index: {}]   ;;  %s2516_s3 = inlined_call_operand.vmem [shape: f32[32,128], index: 3, kind: input, shape index: {}]   ;;  %s2517_s4 = inlined_call_operand.vmem [shape: f32[8,128,32], index: 4, kind: output, shape index: {}]  }
   0x1 LB: > { %s1552_s16 = sadd.s32 4294967295, %s1745_s15   ;;  %p1556_p0 = scmp.ge.s32.totalorder %s1745_s15, 1  ;;  %s1745_s15 = sphi %s1772_s15, %s14_s15  }
   0x2   : > { %p182_p1 = scmp.lt.s32.totalorder %s1745_s15, 9 }
   0x4   : > { %p183_p2 = pnand %p1556_p0, %p182_p1 }
   0x6   : > { %186 = sbr.rel (%p183_p2) target bundleno = 1100 (0x44c), region = 36 }
   0xb   : > { %v289_v0 = vld [vmem:[%s2516_s3 + $0x18] sm:$0xff]  ;;  %v288_v1 = vld [vmem:[%s2516_s3 + $0x10] sm:$0xff]  ;;  %p218_p3 = scmp.lt.s32.totalorder %s1552_s16, 7  ;;  %v287_v2 = vld [vmem:[%s2516_s3 + $0x8] sm:$0xff]  ;;  %vm306_vm0 = vcmask 261120  }
   0xc   : > { %496 = vmatpush.msra.mxu1 %v289_v0  ;;  %367 = vmatpush.msra.mxu0 %v289_v0  ;;  %v286_v3 = vld [vmem:[%s2516_s3] sm:$0xff] }
   0xd   : > { %s2528_s16 = smov (!%p218_p3, %s1552_s16), 7 }
   0xe   : > { %497 = vmatpush.msra.mxu1 %v288_v1  ;;  %368 = vmatpush.msra.mxu0 %v288_v1  ;;  %s1792_s25 = sshll.u32 %s2528_s16, 7 }
   0xf   : > { %s1798_s28 = scalar_lea.vmem %s2514_s1, %s1792_s25  ;;  %s1884_s5 = scalar_lea.vmem %s2513_s0, %s1792_s25 }
  0x10   : > { %498 = vmatpush.msra.mxu1 %v287_v2  ;;  %369 = vmatpush.msra.mxu0 %v287_v2  ;;  %v1801_v4 = vld [vmem:[%s1798_s28] sm:$0xff]  ;;  %v1806_v6 = vld [vmem:[%s1798_s28 + $0x8] sm:$0xff]  ;;  %v1811_v8 = vld [vmem:[%s1798_s28 + $0x10] sm:$0xff]  ;;  %s2286_s8 = scalar_lea.vmem %s2515_s2, %s1792_s25  ;;  %s2397_s11 = scalar_lea.vmem %s2517_s4, %s1792_s25 }
  0x11   : > { %v420_v5 = vmul.f32 0.4204482, %v1801_v4  ;;  %v421_v7 = vmul.f32 0.4204482, %v1806_v6  ;;  %v422_v9 = vmul.f32 0.4204482, %v1811_v8 }
  0x12   : > { %499 = vmatpush.msra.mxu1 %v286_v3  ;;  %370 = vmatpush.msra.mxu0 %v286_v3  ;;  %v1816_v10 = vld [vmem:[%s1798_s28 + $0x18] sm:$0xff]  ;;  %v1821_v12 = vld [vmem:[%s1798_s28 + $0x20] sm:$0xff]  ;;  %v1826_v14 = vld [vmem:[%s1798_s28 + $0x28] sm:$0xff] }
  0x13   : > { %1581 = vmatmul.msk.f32.vlgmr.msra.gmra.mxu1 %vm306_vm0, %v420_v5  ;;  %v423_v11 = vmul.f32 0.4204482, %v1816_v10  ;;  %v424_v13 = vmul.f32 0.4204482, %v1821_v12  ;;  %v425_v15 = vmul.f32 0.4204482, %v1826_v14 }
  0x14   : > { %v1831_v16 = vld [vmem:[%s1798_s28 + $0x30] sm:$0xff]  ;;  %v1836_v18 = vld [vmem:[%s1798_s28 + $0x38] sm:$0xff]  ;;  %v1841_v20 = vld [vmem:[%s1798_s28 + $0x40] sm:$0xff] }
  0x15   : > { %v426_v17 = vmul.f32 0.4204482, %v1831_v16  ;;  %v427_v19 = vmul.f32 0.4204482, %v1836_v18  ;;  %v428_v21 = vmul.f32 0.4204482, %v1841_v20 }
  0x16   : > { %v1846_v22 = vld [vmem:[%s1798_s28 + $0x48] sm:$0xff]  ;;  %v1851_v24 = vld [vmem:[%s1798_s28 + $0x50] sm:$0xff]  ;;  %v1856_v26 = vld [vmem:[%s1798_s28 + $0x58] sm:$0xff] }
  0x17   : > { %v429_v23 = vmul.f32 0.4204482, %v1846_v22  ;;  %v430_v25 = vmul.f32 0.4204482, %v1851_v24  ;;  %v431_v27 = vmul.f32 0.4204482, %v1856_v26 }
  0x18   : > { %v1861_v28 = vld [vmem:[%s1798_s28 + $0x60] sm:$0xff]  ;;  %v1866_v30 = vld [vmem:[%s1798_s28 + $0x68] sm:$0xff]  ;;  %v1871_v32 = vld [vmem:[%s1798_s28 + $0x70] sm:$0xff] }
  0x19   : > { %v432_v29 = vmul.f32 0.4204482, %v1861_v28  ;;  %v433_v31 = vmul.f32 0.4204482, %v1866_v30  ;;  %v434_v33 = vmul.f32 0.4204482, %v1871_v32 }
  0x1a   : > { %v1876_v34 = vld [vmem:[%s1798_s28 + $0x78] sm:$0xff]  ;;  %v1890_v37 = vld [vmem:[%s1884_s5] sm:$0xff]  ;;  %v1898_v40 = vld [vmem:[%s1884_s5 + $0x8] sm:$0xff] }
  0x1b   : > { %1582 = vmatmul.msk.f32.gmra.mxu1 %vm306_vm0, %v421_v7  ;;  %v435_v35 = vmul.f32 0.4204482, %v1876_v34  ;;  %v290_v38 = vmul.f32 0.4204482, %v1890_v37  ;;  %v291_v41 = vmul.f32 0.4204482, %v1898_v40 }
  0x1c   : > { %v1906_v43 = vld [vmem:[%s1884_s5 + $0x10] sm:$0xff]  ;;  %v1914_v46 = vld [vmem:[%s1884_s5 + $0x18] sm:$0xff]  ;;  %v1922_v49 = vld [vmem:[%s1884_s5 + $0x20] sm:$0xff] }
  0x1d   : > { %1565 = vmatmul.msk.f32.vlgmr.msra.gmra.mxu0 %vm306_vm0, %v290_v38  ;;  %v292_v44 = vmul.f32 0.4204482, %v1906_v43  ;;  %v293_v47 = vmul.f32 0.4204482, %v1914_v46  ;;  %v294_v50 = vmul.f32 0.4204482, %v1922_v49 }
  0x1e   : > { %v1930_v52 = vld [vmem:[%s1884_s5 + $0x28] sm:$0xff]  ;;  %v1938_v55 = vld [vmem:[%s1884_s5 + $0x30] sm:$0xff]  ;;  %v1946_v58 = vld [vmem:[%s1884_s5 + $0x38] sm:$0xff] }
  0x1f   : > { %v295_v53 = vmul.f32 0.4204482, %v1930_v52  ;;  %v296_v56 = vmul.f32 0.4204482, %v1938_v55  ;;  %v297_v59 = vmul.f32 0.4204482, %v1946_v58 }
  0x20   : > { %v1954_v61 = vld [vmem:[%s1884_s5 + $0x40] sm:$0xff]  ;;  %v1962_v0 = vld [vmem:[%s1884_s5 + $0x48] sm:$0xff]  ;;  %v1970_v3 = vld [vmem:[%s1884_s5 + $0x50] sm:$0xff] }
  0x21   : > { %v298_v62 = vmul.f32 0.4204482, %v1954_v61  ;;  %v299_v1 = vmul.f32 0.4204482, %v1962_v0  ;;  %v300_v5 = vmul.f32 0.4204482, %v1970_v3 }
  0x23   : > { %1583 = vmatmul.msk.f32.gmra.mxu1 %vm306_vm0, %v422_v9  ;;  %v1978_v9 = vld [vmem:[%s1884_s5 + $0x58] sm:$0xff] }
  0x25   : > { %1566 = vmatmul.msk.f32.gmra.mxu0 %vm306_vm0, %v291_v41 }
  0x2b   : > { %1584 = vmatmul.msk.f32.gmra.mxu1 %vm306_vm0, %v423_v11  ;;  %v301_v11 = vmul.f32 0.4204482, %v1978_v9 }
  0x2d   : > { %1567 = vmatmul.msk.f32.gmra.mxu0 %vm306_vm0, %v292_v44 }
  0x33   : > { %1585 = vmatmul.msk.f32.gmra.mxu1 %vm306_vm0, %v424_v13 }
  0x35   : > { %1568 = vmatmul.msk.f32.gmra.mxu0 %vm306_vm0, %v293_v47  ;;  %v631_v47 = vmul.f32 %v1811_v8, %v1811_v8  ;;  %v636_v8 = vmul.f32 %v1836_v18, %v1836_v18  ;;  %v639_v18 = vmul.f32 %v1851_v24, %v1851_v24  ;;  %v642_v24 = vmul.f32 %v1866_v30, %v1866_v30 }
  0x3b   : > { %1586 = vmatmul.msk.f32.gmra.mxu1 %vm306_vm0, %v425_v15  ;;  %v1986_v15 = vld [vmem:[%s1884_s5 + $0x60] sm:$0xff] }
  0x3d   : > { %1569 = vmatmul.msk.f32.gmra.mxu0 %vm306_vm0, %v294_v50  ;;  %v2025_v50 = vld [vmem:[%s1884_s5 + $0x78] sm:$0xff] }
  0x43   : > { %1587 = vmatmul.msk.f32.gmra.mxu1 %vm306_vm0, %v426_v17  ;;  %v302_v17 = vmul.f32 0.4204482, %v1986_v15 }
  0x45   : > { %1570 = vmatmul.msk.f32.gmra.mxu0 %vm306_vm0, %v295_v53 }
  0x4b   : > { %1588 = vmatmul.msk.f32.gmra.mxu1 %vm306_vm0, %v427_v19 }
  0x4d   : > { %1571 = vmatmul.msk.f32.gmra.mxu0 %vm306_vm0, %v296_v56 }
  0x53   : > { %1589 = vmatmul.msk.f32.gmra.mxu1 %vm306_vm0, %v428_v21  ;;  %v629_v21 = vmul.f32 %v1801_v4, %v1801_v4  ;;  %v630_v4 = vmul.f32 %v1806_v6, %v1806_v6  ;;  %v633_v6 = vmul.f32 %v1821_v12, %v1821_v12  ;;  %v638_v12 = vmul.f32 %v1846_v22, %v1846_v22 }
  0x54   : > { %v641_v22 = vmul.f32 %v1861_v28, %v1861_v28  ;;  %v644_v28 = vmul.f32 %v1876_v34, %v1876_v34  ;;  %v643_v34 = vmul.f32 %v1871_v32, %v1871_v32  ;;  %v551_v32 = vmul.f32 %v1906_v43, %v1906_v43 }
  0x55   : > { %1572 = vmatmul.msk.f32.gmra.mxu0 %vm306_vm0, %v297_v59  ;;  %v648_v38 = vsel %vm306_vm0, %v630_v4, 0.0  ;;  %v657_v56 = vsel %vm306_vm0, %v633_v6, 0.0  ;;  %v305_v59 = vmul.f32 0.4204482, %v2025_v50  ;;  %v553_v43 = vmul.f32 %v1922_v49, %v1922_v49 }
  0x56   : > { %v687_v30 = vsel %vm306_vm0, %v643_v34, 0.0  ;;  %v555_v49 = vmul.f32 %v1938_v55, %v1938_v55  ;;  %v557_v55 = vmul.f32 %v1954_v61, %v1954_v61 }
  0x5b   : > { %1590 = vmatmul.msk.f32.gmra.mxu1 %vm306_vm0, %v429_v23  ;;  %v1996_v23 = vld [vmem:[%s1884_s5 + $0x68] sm:$0xff] }
  0x5d   : > { %1573 = vmatmul.msk.f32.gmra.mxu0 %vm306_vm0, %v298_v62  ;;  %v651_v62 = vsel %vm306_vm0, %v631_v47, 0.0 }
  0x63   : > { %1591 = vmatmul.msk.f32.gmra.mxu1 %vm306_vm0, %v430_v25  ;;  %v303_v25 = vmul.f32 0.4204482, %v1996_v23 }
  0x65   : > { %1574 = vmatmul.msk.f32.gmra.mxu0 %vm306_vm0, %v299_v1 }
  0x6b   : > { %1592 = vmatmul.msk.f32.gmra.mxu1 %vm306_vm0, %v431_v27  ;;  %v645_v27 = vsel %vm306_vm0, %v629_v21, 0.0 }
  0x6d   : > { %1575 = vmatmul.msk.f32.gmra.mxu0 %vm306_vm0, %v300_v5  ;;  %v672_v5 = vsel %vm306_vm0, %v638_v12, 0.0 }
  0x73   : > { %1593 = vmatmul.msk.f32.gmra.mxu1 %vm306_vm0, %v432_v29 }
  0x75   : > { %1576 = vmatmul.msk.f32.gmra.mxu0 %vm306_vm0, %v301_v11  ;;  %v666_v11 = vsel %vm306_vm0, %v636_v8, 0.0 }
  0x7b   : > { %1594 = vmatmul.msk.f32.gmra.mxu1 %vm306_vm0, %v433_v31  ;;  %v632_v31 = vmul.f32 %v1816_v10, %v1816_v10  ;;  %v635_v10 = vmul.f32 %v1831_v16, %v1831_v16  ;;  %v634_v16 = vmul.f32 %v1826_v14, %v1826_v14  ;;  %v637_v14 = vmul.f32 %v1841_v20, %v1841_v20 }
  0x7c   : > { %v640_v20 = vmul.f32 %v1856_v26, %v1856_v26  ;;  %v550_v26 = vmul.f32 %v1898_v40, %v1898_v40  ;;  %v552_v40 = vmul.f32 %v1914_v46, %v1914_v46 }
  0x7d   : > { %1577 = vmatmul.msk.f32.gmra.mxu0 %vm306_vm0, %v302_v17  ;;  %v663_v53 = vsel %vm306_vm0, %v635_v10, 0.0  ;;  %v660_v17 = vsel %vm306_vm0, %v634_v16, 0.0  ;;  %v577_v16 = vsel %vm306_vm0, %v553_v43, 0.0 }
  0x7e   : > { %v568_v47 = vsel %vm306_vm0, %v550_v26, 0.0 }
  0x83   : > { %1595 = vmatmul.msk.f32.gmra.mxu1 %vm306_vm0, %v434_v33  ;;  %v2009_v33 = vld [vmem:[%s1884_s5 + $0x70] sm:$0xff] }
  0x84   : > { %v304_v41 = vmul.f32 0.4204482, %v2009_v33 }
  0x85   : > { %1578 = vmatmul.msk.f32.gmra.mxu0 %vm306_vm0, %v303_v25  ;;  %v681_v25 = vsel %vm306_vm0, %v641_v22, 0.0 }
  0x8b   : > { %1596 = vmatmul.msk.f32.gmra.mxu1 %vm306_vm0, %v435_v35  ;;  %v654_v35 = vsel %vm306_vm0, %v632_v31, 0.0  ;;  %v669_v31 = vsel %vm306_vm0, %v637_v14, 0.0 }
  0x8d   : > { %1579 = vmatmul.msk.f32.gmra.mxu0 %vm306_vm0, %v304_v41  ;;  %v678_v41 = vsel %vm306_vm0, %v640_v20, 0.0 }
  0x90   : > { %v1886_v36 = vpop.f32.mrf.mxu1 }
  0x91   : > { %741 = vmax.xlane.f32.xlu0 %v1886_v36 }
  0x95   : > { %1580 = vmatmul.msk.f32.gmra.mxu0 %vm306_vm0, %v305_v59 }
  0x98   : > { %v1894_v39 = vpop.f32.mrf.mxu1 }
  0x99   : > { %743 = vmax.xlane.f32.xlu0 %v1894_v39 }
  0x9a   : > { %v2038_v1 = vpop.f32.mrf.mxu0 }
  0xa0   : > { %v1902_v42 = vpop.f32.mrf.mxu1 }
  0xa1   : > { %745 = vmax.xlane.f32.xlu1 %v1902_v42 }
  0xa2   : > { %v2049_v21 = vpop.f32.mrf.mxu0 }
  0xa8   : > { %v1910_v45 = vpop.f32.mrf.mxu1 }
  0xa9   : > { %747 = vmax.xlane.f32.xlu1 %v1910_v45 }
  0xaa   : > { %v2060_v4 = vpop.f32.mrf.mxu0 }
  0xb0   : > { %v1918_v48 = vpop.f32.mrf.mxu1 }
  0xb1   : > { %749 = vmax.xlane.f32.xlu2 %v1918_v48 }
  0xb2   : > { %v2067_v10 = vpop.f32.mrf.mxu0 }
  0xb8   : > { %v1926_v51 = vpop.f32.mrf.mxu1 }
  0xb9   : > { %751 = vmax.xlane.f32.xlu2 %v1926_v51 }
  0xba   : > { %v2073_v6 = vpop.f32.mrf.mxu0 }
  0xc0   : > { %v1934_v54 = vpop.f32.mrf.mxu1 }
  0xc1   : > { %753 = vmax.xlane.f32.xlu0 %v1934_v54 }
  0xc8   : > { %v1942_v57 = vpop.f32.mrf.mxu1 }
  0xc9   : > { %755 = vmax.xlane.f32.xlu1 %v1942_v57 }
  0xd0   : > { %v1950_v60 = vpop.f32.mrf.mxu1 }
  0xd1   : > { %757 = vmax.xlane.f32.xlu2 %v1950_v60 }
  0xd8   : > { %v1958_v63 = vpop.f32.mrf.mxu1 }
  0xd9   : > { %759 = vmax.xlane.f32.xlu0 %v1958_v63 }
  0xe0   : > { %v1966_v2 = vpop.f32.mrf.mxu1 }
  0xe1   : > { %761 = vmax.xlane.f32.xlu1 %v1966_v2 }
  0xe8   : > { %v1974_v7 = vpop.f32.mrf.mxu1 }
  0xe9   : > { %763 = vmax.xlane.f32.xlu2 %v1974_v7 }
  0xf0   : > { %v1982_v13 = vpop.f32.mrf.mxu1 }
  0xf1   : > { %765 = vmax.xlane.f32.xlu0 %v1982_v13 }
  0xf8   : > { %v1990_v19 = vpop.f32.mrf.mxu1 }
  0xf9   : > { %767 = vmax.xlane.f32.xlu1 %v1990_v19 }
 0x100   : > { %v2001_v29 = vpop.f32.mrf.mxu1 }
 0x101   : > { %646 = vadd.xlane.f32.xlu1 %v645_v27  ;;  %769 = vmax.xlane.f32.xlu2 %v2001_v29  ;;  %v675_v27 = vsel %vm306_vm0, %v639_v18, 0.0 }
 0x104   : > { %v742_v46 = vpop.xlane.xlu0 %741 }
 0x108   : > { %v2014_v44 = vpop.f32.mrf.mxu1 }
 0x109   : > { %655 = vadd.xlane.f32.xlu1 %v654_v35  ;;  %649 = vadd.xlane.f32.xlu2 %v648_v38  ;;  %v690_v35 = vsel %vm306_vm0, %v644_v28, 0.0  ;;  %v684_v38 = vsel %vm306_vm0, %v642_v24, 0.0 }
 0x10a   : > { %771 = vmax.xlane.f32.xlu0 %v2014_v44 }
 0x111   : > { %664 = vadd.xlane.f32.xlu1 %v663_v53  ;;  %658 = vadd.xlane.f32.xlu2 %v657_v56  ;;  %v2079_v53 = vpop.f32.mrf.mxu0  ;;  %v571_v56 = vsel %vm306_vm0, %v551_v32, 0.0 }
 0x112   : > { %652 = vadd.xlane.f32.xlu0 %v651_v62  ;;  %v574_v62 = vsel %vm306_vm0, %v552_v40, 0.0 }
 0x114   : > { %v746_v12 = vpop.xlane.xlu1 %745 }
 0x119   : > { %673 = vadd.xlane.f32.xlu1 %v672_v5  ;;  %667 = vadd.xlane.f32.xlu2 %v666_v11  ;;  %v2085_v59 = vpop.f32.mrf.mxu0  ;;  %v554_v11 = vmul.f32 %v1930_v52, %v1930_v52  ;;  %v556_v52 = vmul.f32 %v1946_v58, %v1946_v58  ;;  %v558_v58 = vmul.f32 %v1962_v0, %v1962_v0 }
 0x11a   : > { %661 = vadd.xlane.f32.xlu0 %v660_v17 }
 0x11b   : > { %v580_v22 = vsel %vm306_vm0, %v554_v11, 0.0  ;;  %v592_v61 = vsel %vm306_vm0, %v558_v58, 0.0 }
 0x11c   : > { %v748_v17 = vpop.xlane.xlu1 %747 }
 0x121   : > { %682 = vadd.xlane.f32.xlu1 %v681_v25  ;;  %676 = vadd.xlane.f32.xlu2 %v675_v27  ;;  %v2091_v8 = vpop.f32.mrf.mxu0  ;;  %v744_v27 = vpop.xlane.xlu0 %743 }
 0x122   : > { %670 = vadd.xlane.f32.xlu0 %v669_v31  ;;  %2521 = vst [vmem:[#allocation2_spill] sm:$0xff] %v2091_v8  ;;  %v583_v31 = vsel %vm306_vm0, %v555_v49, 0.0 }
 0x124   : > { %v750_v5 = vpop.xlane.xlu2 %749 }
 0x129   : > { %691 = vadd.xlane.f32.xlu1 %v690_v35  ;;  %685 = vadd.xlane.f32.xlu2 %v684_v38  ;;  %v2098_v18 = vpop.f32.mrf.mxu0  ;;  %v586_v38 = vsel %vm306_vm0, %v556_v52, 0.0 }
 0x12a   : > { %679 = vadd.xlane.f32.xlu0 %v678_v41  ;;  %2522 = vst [vmem:[#allocation3_spill] sm:$0xff] %v2098_v18 }
 0x12c   : > { %v752_v14 = vpop.xlane.xlu2 %751 }
 0x12d   : > { %v774_v43 = vmax.f32 %v744_v27, %v752_v14 }
 0x131   : > { %711 = vmax.xlane.f32.xlu1 %v2049_v21  ;;  %v2105_v28 = vpop.f32.mrf.mxu0 }
 0x132   : > { %688 = vadd.xlane.f32.xlu0 %v687_v30  ;;  %2523 = vst [vmem:[#allocation4_spill] sm:$0xff] %v2105_v28 }
 0x134   : > { %v754_v35 = vpop.xlane.xlu0 %753 }
 0x135   : > { %v775_v11 = vmax.f32 %v746_v12, %v754_v35 }
 0x139   : > { %713 = vmax.xlane.f32.xlu1 %v2060_v4  ;;  %v2113_v41 = vpop.f32.mrf.mxu0 }
 0x13a   : > { %569 = vadd.xlane.f32.xlu0 %v568_v47  ;;  %v589_v47 = vsel %vm306_vm0, %v557_v55, 0.0 }
 0x13c   : > { %v756_v25 = vpop.xlane.xlu1 %755 }
 0x141   : > { %715 = vmax.xlane.f32.xlu1 %v2067_v10 }
 0x142   : > { %572 = vadd.xlane.f32.xlu0 %v571_v56 }
 0x144   : > { %v758_v24 = vpop.xlane.xlu2 %757 }
 0x149   : > { %717 = vmax.xlane.f32.xlu1 %v2073_v6 }
 0x14a   : > { %575 = vadd.xlane.f32.xlu0 %v574_v62  ;;  %v2119_v62 = vpop.f32.mrf.mxu0 }
 0x14c   : > { %v760_v26 = vpop.xlane.xlu0 %759 }
 0x14d   : > { %v778_v49 = vmax.f32 %v774_v43, %v760_v26 }
 0x151   : > { %719 = vmax.xlane.f32.xlu1 %v2079_v53 }
 0x152   : > { %578 = vadd.xlane.f32.xlu0 %v577_v16  ;;  %v773_v16 = vmax.f32 %v742_v46, %v750_v5  ;;  %v2126_v5 = vpop.f32.mrf.mxu0 }
 0x154   : > { %v762_v20 = vpop.xlane.xlu1 %761  ;;  %v777_v52 = vmax.f32 %v773_v16, %v758_v24 }
 0x155   : > { %v779_v0 = vmax.f32 %v775_v11, %v762_v20 }
 0x159   : > { %721 = vmax.xlane.f32.xlu1 %v2085_v59 }
 0x15a   : > { %581 = vadd.xlane.f32.xlu0 %v580_v22  ;;  %v776_v22 = vmax.f32 %v748_v17, %v756_v25  ;;  %v2133_v26 = vpop.f32.mrf.mxu0 }
 0x15c   : > { %v764_v34 = vpop.xlane.xlu2 %763 }
 0x161   : > { %723 = vmax.xlane.f32.xlu1 %v2091_v8 }
 0x162   : > { %584 = vadd.xlane.f32.xlu0 %v583_v31  ;;  %v559_v31 = vmul.f32 %v1970_v3, %v1970_v3  ;;  %v560_v3 = vmul.f32 %v1978_v9, %v1978_v9 }
 0x164   : > { %v766_v40 = vpop.xlane.xlu0 %765  ;;  %v595_v27 = vsel %vm306_vm0, %v559_v31, 0.0 }
 0x165   : > { %v781_v8 = vmax.f32 %v777_v52, %v766_v40  ;;  %v561_v40 = vmul.f32 %v1986_v15, %v1986_v15 }
 0x169   : > { %725 = vmax.xlane.f32.xlu1 %v2098_v18 }
 0x16a   : > { %587 = vadd.xlane.f32.xlu0 %v586_v38  ;;  %v780_v38 = vmax.f32 %v776_v22, %v764_v34 }
 0x16c   : > { %v768_v30 = vpop.xlane.xlu1 %767 }
 0x16d   : > { %v782_v55 = vmax.f32 %v778_v49, %v768_v30 }
 0x16f   : > { %v785_v12 = vmax.f32 %v781_v8, %v782_v55  ;;  %v601_v55 = vsel %vm306_vm0, %v561_v40, 0.0 }
 0x171   : > { %727 = vmax.xlane.f32.xlu1 %v2105_v28 }
 0x172   : > { %590 = vadd.xlane.f32.xlu0 %v589_v47 }
 0x174   : > { %v647_v32 = vpop.xlane.xlu1 %646  ;;  %v770_v56 = vpop.xlane.xlu2 %769 }
 0x175   : > { %v783_v58 = vmax.f32 %v779_v0, %v770_v56 }
 0x179   : > { %729 = vmax.xlane.f32.xlu1 %v2113_v41 }
 0x17a   : > { %593 = vadd.xlane.f32.xlu0 %v592_v61  ;;  %v693_v61 = vmul.f32 0.088388346, %v647_v32 }
 0x17c   : > { %v656_v47 = vpop.xlane.xlu1 %655  ;;  %v650_v28 = vpop.xlane.xlu2 %649 }
 0x17d   : > { %v772_v18 = vpop.xlane.xlu0 %771  ;;  %v694_v11 = vmul.f32 0.088388346, %v650_v28  ;;  %v696_v49 = vmul.f32 0.088388346, %v656_v47  ;;  %v562_v47 = vmul.f32 %v1996_v23, %v1996_v23 }
 0x17e   : > { %v784_v14 = vmax.f32 %v780_v38, %v772_v18  ;;  %v598_v18 = vsel %vm306_vm0, %v560_v3, 0.0 }
 0x17f   : > { %v893_v28 = vsub.f32 %v1910_v45, %v696_v49 }
 0x180   : > { %v786_v46 = vmax.f32 %v783_v58, %v784_v14  ;;  %v890_v58 = vsub.f32 %v1886_v36, %v693_v61  ;;  %v891_v14 = vsub.f32 %v1894_v39, %v694_v11  ;;  %v563_v11 = vmul.f32 %v2009_v33, %v2009_v33 }
 0x181   : > { %731 = vmax.xlane.f32.xlu1 %v2119_v62 }
 0x182   : > { %v787_v17 = vmax.f32 %v785_v12, %v786_v46  ;;  %596 = vadd.xlane.f32.xlu0 %v595_v27  ;;  %v2152_v46 = vpop.f32.mrf.mxu0  ;;  %v607_v33 = vsel %vm306_vm0, %v563_v11, 0.0 }
 0x184   : > { %v788_v25 = vrot.slane %v787_v17, 4  ;;  %v665_v24 = vpop.xlane.xlu1 %664  ;;  %v659_v20 = vpop.xlane.xlu2 %658 }
 0x185   : > { %v653_v35 = vpop.xlane.xlu0 %652  ;;  %v697_v52 = vmul.f32 0.088388346, %v659_v20  ;;  %v699_v32 = vmul.f32 0.088388346, %v665_v24 }
 0x186   : > { %v789_v34 = vmax.f32 %v787_v17, %v788_v25  ;;  %v695_v56 = vmul.f32 0.088388346, %v653_v35 }
 0x187   : > { %v894_v27 = vsub.f32 %v1918_v48, %v697_v52  ;;  %v896_v23 = vsub.f32 %v1934_v54, %v699_v32 }
 0x188   : > { %v790_v30 = vrot.slane %v789_v34, 2  ;;  %v892_v0 = vsub.f32 %v1902_v42, %v695_v56 }
 0x189   : > { %733 = vmax.xlane.f32.xlu1 %v2126_v5 }
 0x18a   : > { %v791_v8 = vmax.f32 %v789_v34, %v790_v30  ;;  %599 = vadd.xlane.f32.xlu0 %v598_v18  ;;  %v604_v30 = vsel %vm306_vm0, %v562_v47, 0.0 }
 0x18c   : > { %v792_v9 = vrot.slane %v791_v8, 1  ;;  %v674_v43 = vpop.xlane.xlu1 %673  ;;  %v668_v16 = vpop.xlane.xlu2 %667 }
 0x18d   : > { %v662_v22 = vpop.xlane.xlu0 %661  ;;  %v700_v12 = vmul.f32 0.088388346, %v668_v16  ;;  %v702_v35 = vmul.f32 0.088388346, %v674_v43 }
 0x18e   : > { %v2137_v31 = vmax.f32 %v791_v8, %v792_v9  ;;  %v698_v38 = vmul.f32 0.088388346, %v662_v22 }
 0x18f   : > { %v897_v18 = vsub.f32 %v1942_v57, %v700_v12  ;;  %v899_v54 = vsub.f32 %v1958_v63, %v702_v35 }
 0x190   : > { %v908_v15 = vsub.f32 %v892_v0, %v2137_v31  ;;  %v906_v42 = vsub.f32 %v890_v58, %v2137_v31  ;;  %v895_v36 = vsub.f32 %v1926_v51, %v698_v38  ;;  %v907_v39 = vsub.f32 %v891_v14, %v2137_v31 }
 0x191   : > { %735 = vmax.xlane.f32.xlu1 %v2133_v26  ;;  %v909_v45 = vsub.f32 %v893_v28, %v2137_v31  ;;  %v910_v25 = vsub.f32 %v894_v27, %v2137_v31  ;;  %v912_v56 = vsub.f32 %v896_v23, %v2137_v31  ;;  %v913_v57 = vsub.f32 %v897_v18, %v2137_v31 }
 0x192   : > { %602 = vadd.xlane.f32.xlu0 %v601_v55  ;;  %v926_v24 = vmul.f32 1.442695, %v908_v15  ;;  %v922_v48 = vmul.f32 1.442695, %v906_v42  ;;  %v911_v51 = vsub.f32 %v895_v36, %v2137_v31  ;;  %v924_v8 = vmul.f32 1.442695, %v907_v39  ;;  %v2170_v15 = vpop.f32.mrf.mxu0 }
 0x193   : > { %v928_v40 = vmul.f32 1.442695, %v909_v45  ;;  %v930_v61 = vmul.f32 1.442695, %v910_v25  ;;  %v934_v22 = vmul.f32 1.442695, %v912_v56  ;;  %v915_v55 = vsub.f32 %v899_v54, %v2137_v31 }
 0x194   : > { %v683_v17 = vpop.xlane.xlu1 %682  ;;  %v677_v3 = vpop.xlane.xlu2 %676  ;;  %1643 = vpow2.f32 %v926_v24  ;;  %v932_v43 = vmul.f32 1.442695, %v911_v51  ;;  %v936_v32 = vmul.f32 1.442695, %v913_v57 }
 0x195   : > { %v671_v20 = vpop.xlane.xlu0 %670  ;;  %v703_v9 = vmul.f32 0.088388346, %v677_v3  ;;  %1645 = vpow2.f32 %v922_v48  ;;  %v705_v0 = vmul.f32 0.088388346, %v683_v17  ;;  %v940_v45 = vmul.f32 1.442695, %v915_v55 }
 0x196   : > { %v701_v34 = vmul.f32 0.088388346, %v671_v20  ;;  %1647 = vpow2.f32 %v924_v8 }
 0x197   : > { %1649 = vpow2.f32 %v928_v40  ;;  %v902_v12 = vsub.f32 %v1982_v13, %v705_v0 }
 0x198   : > { %v898_v16 = vsub.f32 %v1950_v60, %v701_v34  ;;  %1651 = vpow2.f32 %v930_v61  ;;  %v900_v60 = vsub.f32 %v1966_v2, %v703_v9  ;;  %v564_v2 = vmul.f32 %v2025_v50, %v2025_v50 }
 0x199   : > { %737 = vmax.xlane.f32.xlu1 %v2152_v46  ;;  %1653 = vpow2.f32 %v932_v43  ;;  %v918_v51 = vsub.f32 %v902_v12, %v2137_v31 }
 0x19a   : > { %605 = vadd.xlane.f32.xlu0 %v604_v30  ;;  %v914_v38 = vsub.f32 %v898_v16, %v2137_v31  ;;  %v1644_v28 = vpop.eup %1643  ;;  %1655 = vpow2.f32 %v934_v22  ;;  %v916_v36 = vsub.f32 %v900_v60, %v2137_v31  ;;  %v610_v34 = vsel %vm306_vm0, %v564_v2, 0.0 }
 0x19b   : > { %v1646_v47 = vpop.eup %1645  ;;  %v956_v20 = vadd.f32 0.0001, %v1644_v28  ;;  %1657 = vpow2.f32 %v936_v32  ;;  %v946_v0 = vmul.f32 1.442695, %v918_v51  ;;  %v549_v32 = vmul.f32 %v1890_v37, %v1890_v37 }
 0x19c   : > { %v692_v49 = vpop.xlane.xlu1 %691  ;;  %v686_v52 = vpop.xlane.xlu2 %685  ;;  %v938_v39 = vmul.f32 1.442695, %v914_v38  ;;  %v954_v17 = vadd.f32 0.0001, %v1646_v47  ;;  %v942_v30 = vmul.f32 1.442695, %v916_v36 }
 0x19d   : > { %v680_v63 = vpop.xlane.xlu0 %679  ;;  %v706_v58 = vmul.f32 0.088388346, %v686_v52  ;;  %v1648_v27 = vpop.eup %1647  ;;  %v708_v23 = vmul.f32 0.088388346, %v692_v49  ;;  %v972_v9 = vmul.f32 0.088388346, %v956_v20 }
 0x19e   : > { %v704_v14 = vmul.f32 0.088388346, %v680_v63  ;;  %v1650_v3 = vpop.eup %1649  ;;  %v955_v24 = vadd.f32 0.0001, %v1648_v27  ;;  %v970_v35 = vmul.f32 0.088388346, %v954_v17  ;;  %1659 = vpow2.f32 %v938_v39 }
 0x19f   : > { %v903_v25 = vsub.f32 %v1990_v19, %v706_v58  ;;  %v957_v8 = vadd.f32 0.0001, %v1650_v3  ;;  %1661 = vpow2.f32 %v940_v45  ;;  %v905_v54 = vsub.f32 %v2014_v44, %v708_v23 }
 0x1a0   : > { %v901_v42 = vsub.f32 %v1974_v7, %v704_v14  ;;  %v1652_v7 = vpop.eup %1651  ;;  %v971_v13 = vmul.f32 0.088388346, %v955_v24  ;;  %1055 = vxpose.xlu2.b32.start [1/16] %v970_v35, 128  ;;  %1663 = vpow2.f32 %v942_v30  ;;  %v565_v45 = vsel %vm306_vm0, %v549_v32, 0.0 }
 0x1a1   : > { %739 = vmax.xlane.f32.xlu1 %v2170_v15  ;;  %v1654_v18 = vpop.eup %1653  ;;  %v919_v40 = vsub.f32 %v903_v25, %v2137_v31  ;;  %v958_v16 = vadd.f32 0.0001, %v1652_v7  ;;  %v2187_v22 = vmul.f32 0.088388346, %v957_v8  ;;  %v921_v14 = vsub.f32 %v905_v54, %v2137_v31 }
 0x1a2   : > { %608 = vadd.xlane.f32.xlu0 %v607_v33  ;;  %v917_v50 = vsub.f32 %v901_v42, %v2137_v31  ;;  %v1656_v56 = vpop.eup %1655  ;;  %v986_v61 = vadd.f32 %v971_v13, %v970_v35  ;;  %v959_v49 = vadd.f32 0.0001, %v1654_v18 }
 0x1a3   : > { %v1658_v52 = vpop.eup %1657  ;;  %v960_v38 = vadd.f32 0.0001, %v1656_v56  ;;  %v948_v63 = vmul.f32 1.442695, %v919_v40  ;;  %v2192_v58 = vmul.f32 0.088388346, %v958_v16 }
 0x1a4   : > { %v2182_v48 = vpop.xlane.xlu1 %711  ;;  %v944_v57 = vmul.f32 1.442695, %v917_v50  ;;  %v987_v11 = vadd.f32 %v986_v61, %v972_v9  ;;  %v1660_v44 = vpop.eup %1659  ;;  %v961_v33 = vadd.f32 0.0001, %v1658_v52  ;;  %v2199_v42 = vmul.f32 0.088388346, %v959_v49 }
 0x1a5   : > { %v689_v19 = vpop.xlane.xlu0 %688  ;;  %v1662_v2 = vpop.eup %1661  ;;  %v2201_v36 = vmul.f32 0.088388346, %v960_v38  ;;  %v962_v39 = vadd.f32 0.0001, %v1660_v44  ;;  %v952_v3 = vmul.f32 1.442695, %v921_v14 }
 0x1a6   : > { %v707_v43 = vmul.f32 0.088388346, %v689_v19  ;;  %v988_v55 = vadd.f32 %v987_v11, %v2187_v22  ;;  %1665 = vpow2.f32 %v944_v57  ;;  %v1664_v17 = vpop.eup %1663  ;;  %v963_v25 = vadd.f32 0.0001, %v1662_v2 }
 0x1a7   : > { %1667 = vpow2.f32 %v946_v0  ;;  %v2205_v24 = vmul.f32 0.088388346, %v961_v33  ;;  %v964_v23 = vadd.f32 0.0001, %v1664_v17  ;;  %v2208_v50 = vmul.f32 0.088388346, %v962_v39 }
 0x1a8   : > { %v904_v60 = vsub.f32 %v2001_v29, %v707_v43  ;;  %v989_v47 = vadd.f32 %v988_v55, %v2192_v58  ;;  %1056 = vxpose.xlu2.b32.cont [2/16] %v971_v13, 128  ;;  %1669 = vpow2.f32 %v948_v63  ;;  %v2212_v51 = vmul.f32 0.088388346, %v963_v25 }
 0x1a9   : > { %709 = vmax.xlane.f32.xlu1 %v2038_v1  ;;  %v2215_v16 = vmul.f32 0.088388346, %v964_v23 }
 0x1aa   : > { %611 = vadd.xlane.f32.xlu0 %v610_v34  ;;  %v920_v28 = vsub.f32 %v904_v60, %v2137_v31  ;;  %v990_v31 = vadd.f32 %v989_v47, %v2199_v42 }
 0x1ac   : > { %v714_v29 = vpop.xlane.xlu1 %713  ;;  %v950_v27 = vmul.f32 1.442695, %v920_v28  ;;  %v991_v20 = vadd.f32 %v990_v31, %v2201_v36  ;;  %v1666_v7 = vpop.eup %1665 }
 0x1ad   : > { %v570_v12 = vpop.xlane.xlu0 %569  ;;  %v1668_v13 = vpop.eup %1667  ;;  %v965_v30 = vadd.f32 0.0001, %v1666_v7 }
 0x1ae   : > { %1671 = vpow2.f32 %v950_v27  ;;  %v614_v37 = vmul.f32 0.088388346, %v570_v12  ;;  %v992_v35 = vadd.f32 %v991_v20, %v2205_v24  ;;  %v1670_v18 = vpop.eup %1669  ;;  %v966_v61 = vadd.f32 0.0001, %v1668_v13 }
 0x1af   : > { %1673 = vpow2.f32 %v952_v3  ;;  %v967_v43 = vadd.f32 0.0001, %v1670_v18 }
 0x1b0   : > { %v795_v34 = vsub.f32 %v2049_v21, %v614_v37  ;;  %v993_v8 = vadd.f32 %v992_v35, %v2208_v50  ;;  %1057 = vxpose.xlu2.b32.cont [3/16] %v972_v9, 128  ;;  %v2219_v21 = vmul.f32 0.088388346, %v965_v30  ;;  %v2223_v38 = vmul.f32 0.088388346, %v966_v61 }
 0x1b1   : > { %v2228_v14 = vmul.f32 0.088388346, %v967_v43 }
 0x1b2   : > { %566 = vadd.xlane.f32.xlu0 %v565_v45  ;;  %v994_v57 = vadd.f32 %v993_v8, %v2212_v51  ;;  %v811_v11 = vsub.f32 %v795_v34, %v2182_v48 }
 0x1b4   : > { %v716_v19 = vpop.xlane.xlu1 %715  ;;  %v1672_v56 = vpop.eup %1671  ;;  %v995_v0 = vadd.f32 %v994_v57, %v2215_v16  ;;  %v828_v55 = vmul.f32 1.442695, %v811_v11 }
 0x1b5   : > { %v573_v40 = vpop.xlane.xlu0 %572  ;;  %v968_v49 = vadd.f32 0.0001, %v1672_v56  ;;  %v1674_v60 = vpop.eup %1673 }
 0x1b6   : > { %v615_v54 = vmul.f32 0.088388346, %v573_v40  ;;  %v996_v63 = vadd.f32 %v995_v0, %v2219_v21  ;;  %v969_v44 = vadd.f32 0.0001, %v1674_v60  ;;  %1675 = vpow2.f32 %v828_v55 }
 0x1b7   : > { %v2230_v28 = vmul.f32 0.088388346, %v968_v49 }
 0x1b8   : > { %v796_v52 = vsub.f32 %v2060_v4, %v615_v54  ;;  %v997_v48 = vadd.f32 %v996_v63, %v2223_v38  ;;  %1058 = vxpose.xlu2.b32.cont [4/16] %v2187_v22, 128 }
 0x1ba   : > { %v2225_v9 = vsub.f32 %v796_v52, %v714_v29  ;;  %v998_v47 = vadd.f32 %v997_v48, %v2228_v14  ;;  %v2235_v29 = vmul.f32 0.088388346, %v969_v44 }
 0x1bc   : > { %v718_v32 = vpop.xlane.xlu1 %717  ;;  %v999_v27 = vadd.f32 %v998_v47, %v2230_v28  ;;  %v1676_v37 = vpop.eup %1675 }
 0x1bd   : > { %v576_v4 = vpop.xlane.xlu0 %575  ;;  %v859_v20 = vadd.f32 0.0001, %v1676_v37 }
 0x1be   : > { %v616_v33 = vmul.f32 0.088388346, %v576_v4  ;;  %v1000_v39 = vadd.f32 %v999_v27, %v2235_v29 }
 0x1bf   : > { %v2244_v18 = vmul.f32 0.088388346, %v859_v20 }
 0x1c0   : > { %v797_v2 = vsub.f32 %v2067_v10, %v616_v33  ;;  %v1001_v17 = vrot.slane %v1000_v39, 4  ;;  %1059 = vxpose.xlu2.b32.cont [5/16] %v2192_v58, 128 }
 0x1c2   : > { %v813_v12 = vsub.f32 %v797_v2, %v716_v19  ;;  %v1002_v25 = vadd.f32 %v1001_v17, %v1000_v39 }
 0x1c4   : > { %v832_v31 = vmul.f32 1.442695, %v813_v12  ;;  %v720_v3 = vpop.xlane.xlu1 %719  ;;  %v1003_v7 = vrot.slane %v1002_v25, 2  ;;  %v2525_v12 = vld [vmem:[#allocation3_spill] sm:$0xff] }
 0x1c5   : > { %v579_v22 = vpop.xlane.xlu0 %578 }
 0x1c6   : > { %1677 = vpow2.f32 %v832_v31  ;;  %v617_v45 = vmul.f32 0.088388346, %v579_v22  ;;  %v1004_v10 = vadd.f32 %v1003_v7, %v1002_v25  ;;  %v2526_v25 = vld [vmem:[#allocation4_spill] sm:$0xff] }
 0x1c8   : > { %v798_v23 = vsub.f32 %v2073_v6, %v617_v45  ;;  %v1005_v34 = vrot.slane %v1004_v10, 1  ;;  %1060 = vxpose.xlu2.b32.cont [6/16] %v2199_v42, 128 }
 0x1ca   : > { %v2242_v35 = vsub.f32 %v798_v23, %v718_v32  ;;  %v2247_v8 = vadd.f32 %v1005_v34, %v1004_v10 }
 0x1cc   : > { %v1678_v13 = vpop.eup %1677  ;;  %v722_v30 = vpop.xlane.xlu1 %721  ;;  %v1008_v40 = vmul.f32 %v2247_v8, %v2244_v18 }
 0x1cd   : > { %v582_v19 = vpop.xlane.xlu0 %581  ;;  %v861_v58 = vadd.f32 0.0001, %v1678_v13 }
 0x1ce   : > { %v618_v56 = vmul.f32 0.088388346, %v582_v19  ;;  %1025 = vadd.xlane.f32.xlu1 %v1008_v40 }
 0x1cf   : > { %v2252_v54 = vmul.f32 0.088388346, %v861_v58 }
 0x1d0   : > { %v799_v6 = vsub.f32 %v2079_v53, %v618_v56  ;;  %1061 = vxpose.xlu2.b32.cont [7/16] %v2201_v36, 128  ;;  %v2524_v36 = vld [vmem:[#allocation2_spill] sm:$0xff] }
 0x1d1   : > { %v1010_v42 = vmul.f32 %v2247_v8, %v2252_v54 }
 0x1d2   : > { %v815_v61 = vsub.f32 %v799_v6, %v720_v3 }
 0x1d4   : > { %v836_v57 = vmul.f32 1.442695, %v815_v61  ;;  %v724_v43 = vpop.xlane.xlu1 %723 }
 0x1d5   : > { %v585_v11 = vpop.xlane.xlu0 %584 }
 0x1d6   : > { %1679 = vpow2.f32 %v836_v57  ;;  %v619_v49 = vmul.f32 0.088388346, %v585_v11  ;;  %1029 = vadd.xlane.f32.xlu1 %v1010_v42  ;;  %v283_v57 = vld [vmem:[%s2286_s8 + $0x68] sm:$0xff]  ;;  %v282_v42 = vld [vmem:[%s2286_s8 + $0x60] sm:$0xff] }
 0x1d8   : > { %v800_v52 = vsub.f32 %v2085_v59, %v619_v49  ;;  %1062 = vxpose.xlu2.b32.cont [8/16] %v2205_v24, 128 }
 0x1da   : > { %v2258_v0 = vsub.f32 %v800_v52, %v722_v30 }
 0x1dc   : > { %v1680_v53 = vpop.eup %1679  ;;  %v726_v60 = vpop.xlane.xlu1 %725 }
 0x1dd   : > { %v863_v63 = vadd.f32 0.0001, %v1680_v53  ;;  %v588_v55 = vpop.xlane.xlu0 %587 }
 0x1de   : > { %v620_v44 = vmul.f32 0.088388346, %v588_v55  ;;  %v280_v55 = vld [vmem:[%s2286_s8 + $0x50] sm:$0xff] }
 0x1df   : > { %v2261_v48 = vmul.f32 0.088388346, %v863_v63 }
 0x1e0   : > { %v801_v32 = vsub.f32 %v2524_v36, %v620_v44  ;;  %1063 = vxpose.xlu2.b32.cont [9/16] %v2208_v50, 128  ;;  %v279_v44 = vld [vmem:[%s2286_s8 + $0x48] sm:$0xff] }
 0x1e1   : > { %v1012_v4 = vmul.f32 %v2247_v8, %v2261_v48 }
 0x1e2   : > { %v817_v33 = vsub.f32 %v801_v32, %v724_v43  ;;  %v278_v32 = vld [vmem:[%s2286_s8 + $0x40] sm:$0xff] }
 0x1e3   : > { %1033 = vadd.xlane.f32.xlu1 %v1012_v4 }
 0x1e4   : > { %v840_v59 = vmul.f32 1.442695, %v817_v33  ;;  %v728_v47 = vpop.xlane.xlu1 %727 }
 0x1e5   : > { %v591_v2 = vpop.xlane.xlu0 %590 }
 0x1e6   : > { %1681 = vpow2.f32 %v840_v59  ;;  %v621_v27 = vmul.f32 0.088388346, %v591_v2  ;;  %v277_v59 = vld [vmem:[%s2286_s8 + $0x38] sm:$0xff] }
 0x1e8   : > { %v802_v24 = vsub.f32 %v2525_v12, %v621_v27  ;;  %1064 = vxpose.xlu2.b32.cont [10/16] %v2212_v51, 128  ;;  %v276_v12 = vld [vmem:[%s2286_s8 + $0x30] sm:$0xff] }
 0x1ea   : > { %v2268_v39 = vsub.f32 %v802_v24, %v726_v60  ;;  %v281_v60 = vld [vmem:[%s2286_s8 + $0x58] sm:$0xff] }
 0x1ec   : > { %v1682_v31 = vpop.eup %1681  ;;  %v730_v17 = vpop.xlane.xlu1 %729 }
 0x1ed   : > { %v865_v3 = vadd.f32 0.0001, %v1682_v31  ;;  %v594_v37 = vpop.xlane.xlu0 %593 }
 0x1ee   : > { %v622_v22 = vmul.f32 0.088388346, %v594_v37 }
 0x1ef   : > { %v2271_v45 = vmul.f32 0.088388346, %v865_v3 }
 0x1f0   : > { %v803_v20 = vsub.f32 %v2526_v25, %v622_v22  ;;  %1065 = vxpose.xlu2.b32.cont [11/16] %v2215_v16, 128  ;;  %v285_v16 = vld [vmem:[%s2286_s8 + $0x78] sm:$0xff]  ;;  %v272_v25 = vld [vmem:[%s2286_s8 + $0x10] sm:$0xff] }
 0x1f1   : > { %v1014_v50 = vmul.f32 %v2247_v8, %v2271_v45  ;;  %1087 = vmatpush.msrb.mxu0 %v285_v16  ;;  %1603 = vmatpush.msra.mxu2 %v285_v16  ;;  %v273_v22 = vld [vmem:[%s2286_s8 + $0x18] sm:$0xff] }
 0x1f2   : > { %v2276_v7 = vsub.f32 %v803_v20, %v728_v47 }
 0x1f3   : > { %1037 = vadd.xlane.f32.xlu1 %v1014_v50 }
 0x1f4   : > { %v732_v10 = vpop.xlane.xlu1 %731 }
 0x1f5   : > { %v597_v23 = vpop.xlane.xlu0 %596 }
 0x1f6   : > { %v623_v13 = vmul.f32 0.088388346, %v597_v23  ;;  %v271_v23 = vld [vmem:[%s2286_s8 + $0x8] sm:$0xff] }
 0x1f8   : > { %v804_v51 = vsub.f32 %v2113_v41, %v623_v13  ;;  %1066 = vxpose.xlu2.b32.cont [12/16] %v2219_v21, 128  ;;  %v270_v13 = vld [vmem:[%s2286_s8] sm:$0xff] }
 0x1fa   : > { %v820_v34 = vsub.f32 %v804_v51, %v730_v17  ;;  %v274_v17 = vld [vmem:[%s2286_s8 + $0x20] sm:$0xff] }
 0x1fc   : > { %v846_v30 = vmul.f32 1.442695, %v820_v34  ;;  %v734_v56 = vpop.xlane.xlu1 %733 }
 0x1fd   : > { %v600_v19 = vpop.xlane.xlu0 %599 }
 0x1fe   : > { %1683 = vpow2.f32 %v846_v30  ;;  %v624_v58 = vmul.f32 0.088388346, %v600_v19 }
 0x200   : > { %v805_v40 = vsub.f32 %v2119_v62, %v624_v58  ;;  %1067 = vxpose.xlu2.b32.cont [13/16] %v2223_v38, 128  ;;  %v284_v62 = vld [vmem:[%s2286_s8 + $0x70] sm:$0xff] }
 0x201   : > { %1088 = vmatpush.msrb.mxu0 %v284_v62  ;;  %1604 = vmatpush.msra.mxu2 %v284_v62 }
 0x202   : > { %v2288_v41 = vsub.f32 %v805_v40, %v732_v10 }
 0x203   : > { %1089 = vmatpush.msrb.mxu0 %v283_v57  ;;  %1605 = vmatpush.msra.mxu2 %v283_v57  ;;  %v834_v57 = vmul.f32 1.442695, %v2242_v35 }
 0x204   : > { %v1684_v6 = vpop.eup %1683  ;;  %v736_v38 = vpop.xlane.xlu1 %735 }
 0x205   : > { %v868_v21 = vadd.f32 0.0001, %v1684_v6  ;;  %v603_v61 = vpop.xlane.xlu0 %602  ;;  %1090 = vmatpush.msrb.mxu0 %v282_v42  ;;  %1606 = vmatpush.msra.mxu2 %v282_v42 }
 0x206   : > { %v625_v43 = vmul.f32 0.088388346, %v603_v61 }
 0x207   : > { %v2294_v11 = vmul.f32 0.088388346, %v868_v21  ;;  %1091 = vmatpush.msrb.mxu0 %v281_v60  ;;  %1607 = vmatpush.msra.mxu2 %v281_v60 }
 0x208   : > { %v806_v49 = vsub.f32 %v2126_v5, %v625_v43  ;;  %1068 = vxpose.xlu2.b32.cont [14/16] %v2228_v14, 128 }
 0x209   : > { %v1017_v52 = vmul.f32 %v2247_v8, %v2294_v11  ;;  %1092 = vmatpush.msrb.mxu0 %v280_v55  ;;  %1608 = vmatpush.msra.mxu2 %v280_v55 }
 0x20a   : > { %v822_v53 = vsub.f32 %v806_v49, %v734_v56 }
 0x20b   : > { %1043 = vadd.xlane.f32.xlu1 %v1017_v52  ;;  %1093 = vmatpush.msrb.mxu0 %v279_v44 }
 0x20c   : > { %v850_v63 = vmul.f32 1.442695, %v822_v53  ;;  %1609 = vmatpush.msra.mxu2 %v279_v44  ;;  %v738_v14 = vpop.xlane.xlu1 %737 }
 0x20d   : > { %v606_v5 = vpop.xlane.xlu0 %605  ;;  %1094 = vmatpush.msrb.mxu0 %v278_v32 }
 0x20e   : > { %1685 = vpow2.f32 %v850_v63  ;;  %v626_v36 = vmul.f32 0.088388346, %v606_v5  ;;  %1610 = vmatpush.msra.mxu2 %v278_v32  ;;  %v844_v5 = vmul.f32 1.442695, %v2276_v7 }
 0x20f   : > { %1095 = vmatpush.msrb.mxu0 %v277_v59 }
 0x210   : > { %v807_v4 = vsub.f32 %v2133_v26, %v626_v36  ;;  %1611 = vmatpush.msra.mxu2 %v277_v59  ;;  %1069 = vxpose.xlu2.b32.cont [15/16] %v2230_v28, 128  ;;  %v275_v26 = vld [vmem:[%s2286_s8 + $0x28] sm:$0xff] }
 0x211   : > { %1096 = vmatpush.msrb.mxu0 %v276_v12 }
 0x212   : > { %v2306_v33 = vsub.f32 %v807_v4, %v736_v38  ;;  %1612 = vmatpush.msra.mxu2 %v276_v12  ;;  %v838_v38 = vmul.f32 1.442695, %v2258_v0  ;;  %v848_v4 = vmul.f32 1.442695, %v2288_v41 }
 0x213   : > { %1097 = vmatpush.msrb.mxu0 %v275_v26 }
 0x214   : > { %v1686_v47 = vpop.eup %1685  ;;  %1613 = vmatpush.msra.mxu2 %v275_v26 }
 0x215   : > { %v870_v2 = vadd.f32 0.0001, %v1686_v47  ;;  %v609_v27 = vpop.xlane.xlu0 %608  ;;  %1098 = vmatpush.msrb.mxu0 %v274_v17 }
 0x216   : > { %v627_v24 = vmul.f32 0.088388346, %v609_v27  ;;  %1614 = vmatpush.msra.mxu2 %v274_v17  ;;  %v852_v27 = vmul.f32 1.442695, %v2306_v33 }
 0x217   : > { %v2312_v31 = vmul.f32 0.088388346, %v870_v2  ;;  %1099 = vmatpush.msrb.mxu0 %v273_v22 }
 0x218   : > { %v808_v3 = vsub.f32 %v2152_v46, %v627_v24  ;;  %1615 = vmatpush.msra.mxu2 %v273_v22  ;;  %1070 = vxpose.xlu2.b32.end [16/16] %v2235_v29, 128  ;;  %v740_v46 = vpop.xlane.xlu1 %739 }
 0x219   : > { %v1019_v37 = vmul.f32 %v2247_v8, %v2312_v31  ;;  %1100 = vmatpush.msrb.mxu0 %v272_v25 }
 0x21a   : > { %v824_v28 = vsub.f32 %v808_v3, %v738_v14  ;;  %1616 = vmatpush.msra.mxu2 %v272_v25 }
 0x21b   : > { %1047 = vadd.xlane.f32.xlu1 %v1019_v37  ;;  %1101 = vmatpush.msrb.mxu0 %v271_v23 }
 0x21c   : > { %v854_v20 = vmul.f32 1.442695, %v824_v28  ;;  %1617 = vmatpush.msra.mxu2 %v271_v23 }
 0x21d   : > { %v612_v50 = vpop.xlane.xlu0 %611  ;;  %1102 = vmatpush.msrb.mxu0 %v270_v13 }
 0x21e   : > { %1687 = vpow2.f32 %v854_v20  ;;  %v628_v10 = vmul.f32 0.088388346, %v612_v50  ;;  %1618 = vmatpush.msra.mxu2 %v270_v13 }
 0x220   : > { %v809_v51 = vsub.f32 %v2170_v15, %v628_v10  ;;  %v710_v29 = vpop.xlane.xlu1 %709  ;;  %v830_v15 = vmul.f32 1.442695, %v2225_v9 }
 0x222   : > { %v825_v34 = vsub.f32 %v809_v51, %v740_v46 }
 0x224   : > { %v1688_v30 = vpop.eup %1687  ;;  %v856_v3 = vmul.f32 1.442695, %v825_v34 }
 0x225   : > { %v872_v19 = vadd.f32 0.0001, %v1688_v30  ;;  %v567_v58 = vpop.xlane.xlu0 %566 }
 0x226   : > { %v613_v56 = vmul.f32 0.088388346, %v567_v58 }
 0x227   : > { %v2324_v40 = vmul.f32 0.088388346, %v872_v19  ;;  %v842_v19 = vmul.f32 1.442695, %v2268_v39 }
 0x228   : > { %v794_v16 = vsub.f32 %v2038_v1, %v613_v56 }
 0x229   : > { %v1021_v6 = vmul.f32 %v2247_v8, %v2324_v40 }
 0x22a   : > { %v810_v21 = vsub.f32 %v794_v16, %v710_v29 }
 0x22b   : > { %1051 = vadd.xlane.f32.xlu1 %v1021_v6 }
 0x22c   : > { %v826_v61 = vmul.f32 1.442695, %v810_v21 }
 0x22e   : > { %1689 = vpow2.f32 %v826_v61 }
 0x22f   : > { %1691 = vpow2.f32 %v830_v15 }
 0x230   : > { %1693 = vpow2.f32 %v834_v57 }
 0x231   : > { %1695 = vpow2.f32 %v838_v38 }
 0x232   : > { %1697 = vpow2.f32 %v844_v5 }
 0x233   : > { %1699 = vpow2.f32 %v848_v4 }
 0x234   : > { %v1690_v62 = vpop.eup %1689  ;;  %1701 = vpow2.f32 %v852_v27 }
 0x235   : > { %v858_v43 = vadd.f32 0.0001, %v1690_v62  ;;  %v1692_v42 = vpop.eup %1691  ;;  %1703 = vpow2.f32 %v856_v3 }
 0x236   : > { %v860_v52 = vadd.f32 0.0001, %v1692_v42  ;;  %v1694_v9 = vpop.eup %1693  ;;  %1705 = vpow2.f32 %v842_v19 }
 0x237   : > { %v2331_v49 = vmul.f32 0.088388346, %v858_v43  ;;  %v862_v63 = vadd.f32 0.0001, %v1694_v9  ;;  %v1696_v44 = vpop.eup %1695 }
 0x238   : > { %v2336_v53 = vmul.f32 0.088388346, %v860_v52  ;;  %v864_v0 = vadd.f32 0.0001, %v1696_v44  ;;  %v1698_v59 = vpop.eup %1697 }
 0x239   : > { %v1007_v1 = vmul.f32 %v2247_v8, %v2331_v49  ;;  %v1071_v60 = vpop.trf.xlu2  ;;  %v2341_v55 = vmul.f32 0.088388346, %v862_v63  ;;  %v867_v7 = vadd.f32 0.0001, %v1698_v59  ;;  %v1700_v26 = vpop.eup %1699 }
 0x23a   : > { %1103 = vmatmul.f32.vlgmr.msrb.gmra.mxu0 %v1071_v60  ;;  %v1009_v35 = vmul.f32 %v2247_v8, %v2336_v53  ;;  %v2346_v14 = vmul.f32 0.088388346, %v864_v0  ;;  %v869_v41 = vadd.f32 0.0001, %v1700_v26  ;;  %v1702_v22 = vpop.eup %1701 }
 0x23b   : > { %1023 = vadd.xlane.f32.xlu0 %v1007_v1  ;;  %v1011_v32 = vmul.f32 %v2247_v8, %v2341_v55  ;;  %v2351_v12 = vmul.f32 0.088388346, %v867_v7  ;;  %v871_v25 = vadd.f32 0.0001, %v1702_v22  ;;  %v1704_v50 = vpop.eup %1703 }
 0x23c   : > { %v1013_v2 = vmul.f32 %v2247_v8, %v2346_v14  ;;  %v2355_v37 = vmul.f32 0.088388346, %v869_v41  ;;  %v873_v23 = vadd.f32 0.0001, %v1704_v50  ;;  %v1706_v56 = vpop.eup %1705 }
 0x23d   : > { %v1016_v17 = vmul.f32 %v2247_v8, %v2351_v12  ;;  %v2359_v20 = vmul.f32 0.088388346, %v871_v25  ;;  %v866_v29 = vadd.f32 0.0001, %v1706_v56 }
 0x23e   : > { %v1018_v33 = vmul.f32 %v2247_v8, %v2355_v37  ;;  %v2363_v13 = vmul.f32 0.088388346, %v873_v23 }
 0x23f   : > { %v1020_v10 = vmul.f32 %v2247_v8, %v2359_v20  ;;  %v2368_v6 = vmul.f32 0.088388346, %v866_v29 }
 0x240   : > { %v1022_v34 = vmul.f32 %v2247_v8, %v2363_v13 }
 0x241   : > { %v1072_v36 = vpop.trf.xlu2  ;;  %v1015_v21 = vmul.f32 %v2247_v8, %v2368_v6 }
 0x242   : > { %1106 = vmatmul.f32.vlgmr.msra.gmra.mxu2 %v1072_v36 }
 0x243   : > { %1027 = vadd.xlane.f32.xlu0 %v1009_v35 }
 0x249   : > { %v1073_v47 = vpop.trf.xlu2 }
 0x24a   : > { %1109 = vmatmul.f32.gmra.mxu2 %v1073_v47 }
 0x24b   : > { %1031 = vadd.xlane.f32.xlu0 %v1011_v32 }
 0x251   : > { %v1074_v24 = vpop.trf.xlu2 }
 0x252   : > { %1112 = vmatmul.f32.gmra.mxu2 %v1074_v24 }
 0x253   : > { %1035 = vadd.xlane.f32.xlu0 %v1013_v2 }
 0x259   : > { %v1075_v28 = vpop.trf.xlu2 }
 0x25a   : > { %1115 = vmatmul.f32.gmra.mxu2 %v1075_v28 }
 0x25b   : > { %1041 = vadd.xlane.f32.xlu0 %v1016_v17 }
 0x261   : > { %v1076_v46 = vpop.trf.xlu2 }
 0x262   : > { %1118 = vmatmul.f32.gmra.mxu2 %v1076_v46 }
 0x263   : > { %1045 = vadd.xlane.f32.xlu0 %v1018_v33 }
 0x269   : > { %v1077_v51 = vpop.trf.xlu2 }
 0x26a   : > { %1121 = vmatmul.f32.gmra.mxu2 %v1077_v51 }
 0x26b   : > { %1049 = vadd.xlane.f32.xlu0 %v1020_v10 }
 0x271   : > { %v1078_v30 = vpop.trf.xlu2 }
 0x272   : > { %1124 = vmatmul.f32.gmra.mxu2 %v1078_v30 }
 0x273   : > { %1053 = vadd.xlane.f32.xlu0 %v1022_v34 }
 0x279   : > { %v1079_v58 = vpop.trf.xlu2 }
 0x27a   : > { %1127 = vmatmul.f32.gmra.mxu2 %v1079_v58 }
 0x281   : > { %v1080_v16 = vpop.trf.xlu2 }
 0x282   : > { %1130 = vmatmul.f32.gmra.mxu2 %v1080_v16 }
 0x289   : > { %v1081_v15 = vpop.trf.xlu2  ;;  %1039 = vadd.xlane.f32.xlu2 %v1015_v21 }
 0x28a   : > { %1133 = vmatmul.f32.gmra.mxu2 %v1081_v15 }
 0x291   : > { %v1082_v61 = vpop.trf.xlu2 }
 0x292   : > { %1136 = vmatmul.f32.gmra.mxu2 %v1082_v61 }
 0x299   : > { %v1083_v62 = vpop.trf.xlu2 }
 0x29a   : > { %1139 = vmatmul.f32.gmra.mxu2 %v1083_v62 }
 0x2a1   : > { %v1084_v39 = vpop.trf.xlu2 }
 0x2a2   : > { %1142 = vmatmul.f32.gmra.mxu2 %v1084_v39 }
 0x2a9   : > { %v1085_v57 = vpop.trf.xlu2 }
 0x2aa   : > { %1145 = vmatmul.f32.gmra.mxu2 %v1085_v57 }
 0x2b1   : > { %v1086_v43 = vpop.trf.xlu2 }
 0x2b2   : > { %1148 = vmatmul.f32.gmra.mxu2 %v1086_v43 }
 0x2b7   : > { %v1104_v59 = vpop.f32.mrf.mxu0 }
 0x2c5   : > { %v1107_v42 = vpop.f32.mrf.mxu2 }
 0x2cd   : > { %v1110_v52 = vpop.f32.mrf.mxu2 }
 0x2d5   : > { %v1113_v1 = vpop.f32.mrf.mxu2 }
 0x2dd   : > { %v1116_v38 = vpop.f32.mrf.mxu2 }
 0x2e5   : > { %v1119_v9 = vpop.f32.mrf.mxu2 }
 0x2ed   : > { %v1122_v60 = vpop.f32.mrf.mxu2 }
 0x2f5   : > { %v1125_v8 = vpop.f32.mrf.mxu2 }
 0x2fd   : > { %v1128_v63 = vpop.f32.mrf.mxu2 }
 0x305   : > { %v1131_v35 = vpop.f32.mrf.mxu2 }
 0x30d   : > { %v1134_v5 = vpop.f32.mrf.mxu2 }
 0x315   : > { %v1137_v44 = vpop.f32.mrf.mxu2 }
 0x31d   : > { %v1140_v36 = vpop.f32.mrf.mxu2 }
 0x325   : > { %v1143_v0 = vpop.f32.mrf.mxu2 }
 0x32d   : > { %v1146_v32 = vpop.f32.mrf.mxu2 }
 0x335   : > { %v1149_v4 = vpop.f32.mrf.mxu2 }
 0x336   : > { %1152 = vmatpush.msrb.mxu1 %v1149_v4  ;;  %1619 = vmatpush.msra.mxu3 %v1149_v4 }
 0x338   : > { %1153 = vmatpush.msrb.mxu1 %v1146_v32  ;;  %1620 = vmatpush.msra.mxu3 %v1146_v32 }
 0x33a   : > { %1154 = vmatpush.msrb.mxu1 %v1143_v0  ;;  %1621 = vmatpush.msra.mxu3 %v1143_v0 }
 0x33c   : > { %1155 = vmatpush.msrb.mxu1 %v1140_v36  ;;  %1622 = vmatpush.msra.mxu3 %v1140_v36 }
 0x33e   : > { %1156 = vmatpush.msrb.mxu1 %v1137_v44  ;;  %1623 = vmatpush.msra.mxu3 %v1137_v44 }
 0x340   : > { %1157 = vmatpush.msrb.mxu1 %v1134_v5  ;;  %1624 = vmatpush.msra.mxu3 %v1134_v5 }
 0x342   : > { %1158 = vmatpush.msrb.mxu1 %v1131_v35  ;;  %1625 = vmatpush.msra.mxu3 %v1131_v35 }
 0x344   : > { %1159 = vmatpush.msrb.mxu1 %v1128_v63  ;;  %1626 = vmatpush.msra.mxu3 %v1128_v63 }
 0x346   : > { %1160 = vmatpush.msrb.mxu1 %v1125_v8  ;;  %1627 = vmatpush.msra.mxu3 %v1125_v8 }
 0x348   : > { %1161 = vmatpush.msrb.mxu1 %v1122_v60  ;;  %1628 = vmatpush.msra.mxu3 %v1122_v60 }
 0x34a   : > { %1162 = vmatpush.msrb.mxu1 %v1119_v9  ;;  %1629 = vmatpush.msra.mxu3 %v1119_v9 }
 0x34c   : > { %1163 = vmatpush.msrb.mxu1 %v1116_v38  ;;  %1630 = vmatpush.msra.mxu3 %v1116_v38 }
 0x34e   : > { %1164 = vmatpush.msrb.mxu1 %v1113_v1  ;;  %1631 = vmatpush.msra.mxu3 %v1113_v1 }
 0x350   : > { %1165 = vmatpush.msrb.mxu1 %v1110_v52  ;;  %1632 = vmatpush.msra.mxu3 %v1110_v52 }
 0x352   : > { %1166 = vmatpush.msrb.mxu1 %v1107_v42  ;;  %1633 = vmatpush.msra.mxu3 %v1107_v42 }
 0x354   : > { %1167 = vmatpush.msrb.mxu1 %v1104_v59  ;;  %1634 = vmatpush.msra.mxu3 %v1104_v59 }
 0x355   : > { %1168 = vmatmul.f32.vlgmr.msrb.gmra.mxu1 %v2331_v49  ;;  %1171 = vmatmul.f32.vlgmr.msra.gmra.mxu3 %v2244_v18  ;;  %v1024_v18 = vpop.xlane.xlu0 %1023 }
 0x356   : > { %1707 = vrcp.f32 %v1024_v18  ;;  %v1228_v27 = vand.u32 2147483648, %v1024_v18  ;;  %vm1222_vm2 = vweird.f32 %v1024_v18 }
 0x358   : > { %v1229_v41 = vor.u32 1.1754944e-38, %v1228_v27 }
 0x35d   : > { %1174 = vmatmul.f32.gmra.mxu3 %v2336_v53  ;;  %v1028_v49 = vpop.xlane.xlu0 %1027 }
 0x35e   : > { %v1258_v16 = vand.u32 2147483648, %v1028_v49  ;;  %vm1252_vm10 = vweird.f32 %v1028_v49 }
 0x360   : > { %v1259_v62 = vor.u32 1.1754944e-38, %v1258_v16 }
 0x365   : > { %1177 = vmatmul.f32.gmra.mxu3 %v2252_v54  ;;  %v1026_v54 = vpop.xlane.xlu1 %1025  ;;  %v2391_v3 = vpop.xlane.xlu0 %1031 }
 0x366   : > { %1709 = vrcp.f32 %v1026_v54  ;;  %v1243_v33 = vand.u32 2147483648, %v1026_v54  ;;  %vm1237_vm6 = vweird.f32 %v1026_v54  ;;  %v1241_v50 = vand.u32 2147483647, %v1026_v54 }
 0x367   : > { %1711 = vrcp.f32 %v1028_v49 }
 0x368   : > { %vm1242_vm8 = vcmp.eq.f32.partialorder %v1241_v50, 8.507059e+37 }
 0x36d   : > { %1180 = vmatmul.f32.gmra.mxu3 %v2341_v55  ;;  %v2409_v42 = vpop.xlane.xlu0 %1035 }
 0x36e   : > { %v1318_v50 = vand.u32 2147483648, %v2409_v42 }
 0x375   : > { %1183 = vmatmul.f32.gmra.mxu3 %v2261_v48  ;;  %v1708_v48 = vpop.eup %1707 }
 0x376   : > { %v1710_v53 = vpop.eup %1709  ;;  %vm1223_vm1 = vweird.f32 %v1708_v48 }
 0x377   : > { %v1712_v7 = vpop.eup %1711  ;;  %vm1224_vm3 = vmor %vm1222_vm2, %vm1223_vm1  ;;  %vm1238_vm5 = vweird.f32 %v1710_v53 }
 0x378   : > { %vm1239_vm7 = vmor %vm1237_vm6, %vm1238_vm5  ;;  %vm1253_vm9 = vweird.f32 %v1712_v7 }
 0x379   : > { %vm1254_vm11 = vmor %vm1252_vm10, %vm1253_vm9 }
 0x37d   : > { %1186 = vmatmul.f32.gmra.mxu3 %v2346_v14  ;;  %v1233_v14 = vmul.f32 %v1710_v53, %v1026_v54  ;;  %v1288_v54 = vand.u32 2147483648, %v2391_v3 }
 0x37f   : > { %v1234_v47 = vsub.f32 1.0, %v1233_v14 }
 0x381   : > { %v1235_v26 = vmul.f32 %v1710_v53, %v1234_v47 }
 0x385   : > { %1189 = vmatmul.f32.gmra.mxu3 %v2271_v45  ;;  %v1218_v45 = vmul.f32 %v1708_v48, %v1024_v18 }
 0x387   : > { %v1219_v55 = vsub.f32 1.0, %v1218_v45 }
 0x38d   : > { %1192 = vmatmul.f32.gmra.mxu3 %v2368_v6  ;;  %v1256_v6 = vand.u32 2147483647, %v1028_v49 }
 0x38f   : > { %vm1257_vm12 = vcmp.eq.f32.partialorder %v1256_v6, 8.507059e+37 }
 0x395   : > { %1195 = vmatmul.f32.gmra.mxu3 %v2351_v12  ;;  %v1226_v12 = vand.u32 2147483647, %v1024_v18 }
 0x397   : > { %vm1227_vm4 = vcmp.eq.f32.partialorder %v1226_v12, 8.507059e+37 }
 0x39d   : > { %1198 = vmatmul.f32.gmra.mxu3 %v2294_v11  ;;  %v1220_v11 = vmul.f32 %v1708_v48, %v1219_v55  ;;  %v1289_v55 = vor.u32 1.1754944e-38, %v1288_v54 }
 0x39f   : > { %v1221_v2 = vadd.f32 %v1708_v48, %v1220_v11 }
 0x3a1   : > { %v1225_v24 = vsel %vm1224_vm3, %v1708_v48, %v1221_v2  ;;  %vm1282_vm3 = vweird.f32 %v2391_v3  ;;  %v1286_v48 = vand.u32 2147483647, %v2391_v3 }
 0x3a2   : > { %v1230_v25 = vsel %vm1227_vm4, %v1229_v41, %v1225_v24 }
 0x3a3   : > { %vm1287_vm5 = vcmp.eq.f32.partialorder %v1286_v48, 8.507059e+37 }
 0x3a5   : > { %1201 = vmatmul.f32.gmra.mxu3 %v2355_v37  ;;  %v1236_v37 = vadd.f32 %v1710_v53, %v1235_v26 }
 0x3a7   : > { %v1240_v23 = vsel %vm1239_vm7, %v1710_v53, %v1236_v37 }
 0x3ad   : > { %1204 = vmatmul.f32.gmra.mxu3 %v2312_v31  ;;  %v2388_v31 = vpop.xlane.xlu1 %1029 }
 0x3ae   : > { %1713 = vrcp.f32 %v2388_v31  ;;  %v1273_v9 = vand.u32 2147483648, %v2388_v31  ;;  %vm1267_vm14 = vweird.f32 %v2388_v31  ;;  %v1271_v60 = vand.u32 2147483647, %v2388_v31 }
 0x3af   : > { %1715 = vrcp.f32 %v2391_v3 }
 0x3b0   : > { %v1274_v5 = vor.u32 1.1754944e-38, %v1273_v9  ;;  %vm1272_vm1 = vcmp.eq.f32.partialorder %v1271_v60, 8.507059e+37 }
 0x3b4   : > { %v1714_v22 = vpop.eup %1713 }
 0x3b5   : > { %1207 = vmatmul.f32.gmra.mxu3 %v2359_v20  ;;  %v1263_v46 = vmul.f32 %v1714_v22, %v2388_v31  ;;  %v2403_v19 = vpop.xlane.xlu1 %1033  ;;  %v1716_v29 = vpop.eup %1715  ;;  %vm1268_vm13 = vweird.f32 %v1714_v22 }
 0x3b6   : > { %1717 = vrcp.f32 %v2403_v19  ;;  %v1278_v21 = vmul.f32 %v1716_v29, %v2391_v3  ;;  %vm1269_vm15 = vmor %vm1267_vm14, %vm1268_vm13  ;;  %vm1283_vm2 = vweird.f32 %v1716_v29  ;;  %v2427_v31 = vpop.xlane.xlu2 %1039  ;;  %vm1297_vm7 = vweird.f32 %v2403_v19 }
 0x3b7   : > { %v1264_v30 = vsub.f32 1.0, %v1263_v46  ;;  %1719 = vrcp.f32 %v2409_v42  ;;  %vm1284_vm4 = vmor %vm1282_vm3, %vm1283_vm2  ;;  %v1301_v12 = vand.u32 2147483647, %v2403_v19  ;;  %v1316_v46 = vand.u32 2147483647, %v2409_v42 }
 0x3b8   : > { %v1279_v43 = vsub.f32 1.0, %v1278_v21  ;;  %v1348_v60 = vand.u32 2147483648, %v2427_v31 }
 0x3b9   : > { %v1265_v61 = vmul.f32 %v1714_v22, %v1264_v30  ;;  %vm1302_vm9 = vcmp.eq.f32.partialorder %v1301_v12, 8.507059e+37  ;;  %vm1317_vm13 = vcmp.eq.f32.partialorder %v1316_v46, 8.507059e+37 }
 0x3ba   : > { %v1280_v35 = vmul.f32 %v1716_v29, %v1279_v43 }
 0x3bb   : > { %v1266_v1 = vadd.f32 %v1714_v22, %v1265_v61 }
 0x3bc   : > { %v1718_v38 = vpop.eup %1717  ;;  %v1281_v59 = vadd.f32 %v1716_v29, %v1280_v35 }
 0x3bd   : > { %1210 = vmatmul.f32.gmra.mxu3 %v2324_v40  ;;  %v1248_v40 = vmul.f32 %v1712_v7, %v1028_v49  ;;  %v1293_v8 = vmul.f32 %v1718_v38, %v2403_v19  ;;  %v1270_v63 = vsel %vm1269_vm15, %v1714_v22, %v1266_v1  ;;  %v2418_v32 = vpop.xlane.xlu1 %1037  ;;  %v1720_v18 = vpop.eup %1719  ;;  %vm1298_vm6 = vweird.f32 %v1718_v38 }
 0x3be   : > { %v1275_v36 = vsel %vm1272_vm1, %v1274_v5, %v1270_v63  ;;  %1721 = vrcp.f32 %v2418_v32  ;;  %v1308_v45 = vmul.f32 %v1720_v18, %v2409_v42  ;;  %v1285_v49 = vsel %vm1284_vm4, %v1716_v29, %v1281_v59 }
 0x3bf   : > { %v1249_v17 = vsub.f32 1.0, %v1248_v40  ;;  %v1294_v0 = vsub.f32 1.0, %v1293_v8  ;;  %v1290_v11 = vsel %vm1287_vm5, %v1289_v55, %v1285_v49  ;;  %v1303_v40 = vand.u32 2147483648, %v2403_v19 }
 0x3c0   : > { %v1309_v47 = vsub.f32 1.0, %v1308_v45  ;;  %1723 = vrcp.f32 %v2427_v31  ;;  %vm1313_vm10 = vweird.f32 %v1720_v18  ;;  %v1333_v6 = vand.u32 2147483648, %v2418_v32 }
 0x3c1   : > { %v1250_v10 = vmul.f32 %v1712_v7, %v1249_v17  ;;  %v1295_v53 = vmul.f32 %v1718_v38, %v1294_v0  ;;  %v1304_v17 = vor.u32 1.1754944e-38, %v1303_v40  ;;  %vm1327_vm15 = vweird.f32 %v2418_v32 }
 0x3c2   : > { %v1310_v41 = vmul.f32 %v1720_v18, %v1309_v47  ;;  %v1331_v21 = vand.u32 2147483647, %v2418_v32  ;;  %vm1342_vm4 = vweird.f32 %v2427_v31  ;;  %v1346_v8 = vand.u32 2147483647, %v2427_v31 }
 0x3c3   : > { %v1251_v56 = vadd.f32 %v1712_v7, %v1250_v10  ;;  %v1296_v2 = vadd.f32 %v1718_v38, %v1295_v53 }
 0x3c4   : > { %v1722_v27 = vpop.eup %1721  ;;  %vm1332_vm2 = vcmp.eq.f32.partialorder %v1331_v21, 8.507059e+37 }
 0x3c5   : > { %1213 = vmatmul.f32.gmra.mxu3 %v2363_v13  ;;  %v1244_v13 = vor.u32 1.1754944e-38, %v1243_v33  ;;  %v1255_v15 = vsel %vm1254_vm11, %v1712_v7, %v1251_v56  ;;  %v1323_v26 = vmul.f32 %v1722_v27, %v2418_v32  ;;  %v1311_v33 = vadd.f32 %v1720_v18, %v1310_v41  ;;  %v2445_v19 = vpop.xlane.xlu1 %1043 }
 0x3c6   : > { %v1260_v57 = vsel %vm1257_vm12, %v1259_v62, %v1255_v15  ;;  %vm1312_vm11 = vweird.f32 %v2409_v42  ;;  %vm1328_vm14 = vweird.f32 %v1722_v27  ;;  %v1378_v12 = vand.u32 2147483648, %v2445_v19 }
 0x3c7   : > { %v1245_v34 = vsel %vm1242_vm8, %v1244_v13, %v1240_v23  ;;  %vm1299_vm8 = vmor %vm1297_vm7, %vm1298_vm6  ;;  %v1324_v22 = vsub.f32 1.0, %v1323_v26  ;;  %vm1347_vm6 = vcmp.eq.f32.partialorder %v1346_v8, 8.507059e+37  ;;  %v1376_v26 = vand.u32 2147483647, %v2445_v19 }
 0x3c8   : > { %v1300_v24 = vsel %vm1299_vm8, %v1718_v38, %v1296_v2  ;;  %vm1314_vm12 = vmor %vm1312_vm11, %vm1313_vm10 }
 0x3c9   : > { %v1305_v37 = vsel %vm1302_vm9, %v1304_v17, %v1300_v24  ;;  %v1315_v10 = vsel %vm1314_vm12, %v1720_v18, %v1311_v33  ;;  %v1325_v13 = vmul.f32 %v1722_v27, %v1324_v22  ;;  %vm1329_vm1 = vmor %vm1327_vm15, %vm1328_vm14  ;;  %vm1372_vm12 = vweird.f32 %v2445_v19 }
 0x3ca   : > { %vm1377_vm14 = vcmp.eq.f32.partialorder %v1376_v26, 8.507059e+37 }
 0x3cb   : > { %v1326_v29 = vadd.f32 %v1722_v27, %v1325_v13 }
 0x3cd   : > { %v1330_v62 = vsel %vm1329_vm1, %v1722_v27, %v1326_v29 }
 0x3d2   : > { %v1169_v28 = vpop.f32.mrf.mxu1 }
 0x3d3   : > { %v1231_v20 = vmul.f32 %v1230_v25, %v1169_v28  ;;  %v2436_v28 = vpop.xlane.xlu0 %1041 }
 0x3d4   : > { %1725 = vrcp.f32 %v2436_v28  ;;  %v1363_v48 = vand.u32 2147483648, %v2436_v28  ;;  %vm1357_vm8 = vweird.f32 %v2436_v28  ;;  %v1361_v45 = vand.u32 2147483647, %v2436_v28 }
 0x3d5   : > { %1457 = vst.msk [vmem:[%s2397_s11] sm:$0xff] %vm306_vm0, %v1231_v20  ;;  %v1724_v20 = vpop.eup %1723  ;;  %1727 = vrcp.f32 %v2445_v19 }
 0x3d6   : > { %v1338_v23 = vmul.f32 %v1724_v20, %v2427_v31  ;;  %vm1343_vm3 = vweird.f32 %v1724_v20  ;;  %vm1362_vm10 = vcmp.eq.f32.partialorder %v1361_v45, 8.507059e+37 }
 0x3d7   : > { %vm1344_vm5 = vmor %vm1342_vm4, %vm1343_vm3 }
 0x3d8   : > { %v1172_v51 = vpop.f32.mrf.mxu3 }
 0x3d9   : > { %v1246_v58 = vmul.f32 %v1245_v34, %v1172_v51  ;;  %v1319_v51 = vor.u32 1.1754944e-38, %v1318_v50 }
 0x3da   : > { %v1726_v16 = vpop.eup %1725 }
 0x3db   : > { %1458 = vst.msk [vmem:[%s2397_s11 + $0x8] sm:$0xff] %vm306_vm0, %v1246_v58  ;;  %v1320_v30 = vsel %vm1317_vm13, %v1319_v51, %v1315_v10  ;;  %v1339_v58 = vsub.f32 1.0, %v1338_v23  ;;  %v1353_v15 = vmul.f32 %v1726_v16, %v2436_v28  ;;  %v1728_v9 = vpop.eup %1727  ;;  %vm1358_vm7 = vweird.f32 %v1726_v16 }
 0x3dc   : > { %v1368_v63 = vmul.f32 %v1728_v9, %v2445_v19  ;;  %vm1359_vm9 = vmor %vm1357_vm8, %vm1358_vm7  ;;  %vm1373_vm11 = vweird.f32 %v1728_v9 }
 0x3dd   : > { %v1340_v61 = vmul.f32 %v1724_v20, %v1339_v58  ;;  %v1354_v42 = vsub.f32 1.0, %v1353_v15  ;;  %vm1374_vm13 = vmor %vm1372_vm12, %vm1373_vm11 }
 0x3de   : > { %v1369_v32 = vsub.f32 1.0, %v1368_v63 }
 0x3df   : > { %v1341_v38 = vadd.f32 %v1724_v20, %v1340_v61  ;;  %v1355_v5 = vmul.f32 %v1726_v16, %v1354_v42 }
 0x3e0   : > { %v1175_v39 = vpop.f32.mrf.mxu3  ;;  %v1370_v55 = vmul.f32 %v1728_v9, %v1369_v32 }
 0x3e1   : > { %v1261_v52 = vmul.f32 %v1260_v57, %v1175_v39  ;;  %v1334_v39 = vor.u32 1.1754944e-38, %v1333_v6  ;;  %v1345_v35 = vsel %vm1344_vm5, %v1724_v20, %v1341_v38  ;;  %v1356_v18 = vadd.f32 %v1726_v16, %v1355_v5 }
 0x3e2   : > { %v1371_v27 = vadd.f32 %v1728_v9, %v1370_v55 }
 0x3e3   : > { %1459 = vst.msk [vmem:[%s2397_s11 + $0x10] sm:$0xff] %vm306_vm0, %v1261_v52  ;;  %v1335_v43 = vsel %vm1332_vm2, %v1334_v39, %v1330_v62  ;;  %v2454_v52 = vpop.xlane.xlu0 %1045  ;;  %v1360_v53 = vsel %vm1359_vm9, %v1726_v16, %v1356_v18 }
 0x3e4   : > { %1729 = vrcp.f32 %v2454_v52  ;;  %v1375_v41 = vsel %vm1374_vm13, %v1728_v9, %v1371_v27  ;;  %v1393_v46 = vand.u32 2147483648, %v2454_v52  ;;  %vm1387_vm1 = vweird.f32 %v2454_v52 }
 0x3e5   : > { %v1391_v23 = vand.u32 2147483647, %v2454_v52 }
 0x3e7   : > { %vm1392_vm3 = vcmp.eq.f32.partialorder %v1391_v23, 8.507059e+37 }
 0x3e8   : > { %v1178_v44 = vpop.f32.mrf.mxu3 }
 0x3e9   : > { %v1276_v4 = vmul.f32 %v1275_v36, %v1178_v44  ;;  %v1349_v44 = vor.u32 1.1754944e-38, %v1348_v60 }
 0x3ea   : > { %v1730_v54 = vpop.eup %1729 }
 0x3eb   : > { %1460 = vst.msk [vmem:[%s2397_s11 + $0x18] sm:$0xff] %vm306_vm0, %v1276_v4  ;;  %v1350_v0 = vsel %vm1347_vm6, %v1349_v44, %v1345_v35  ;;  %v2463_v4 = vpop.xlane.xlu1 %1047  ;;  %v1383_v49 = vmul.f32 %v1730_v54, %v2454_v52  ;;  %vm1388_vm15 = vweird.f32 %v1730_v54 }
 0x3ec   : > { %1731 = vrcp.f32 %v2463_v4  ;;  %vm1389_vm2 = vmor %vm1387_vm1, %vm1388_vm15  ;;  %v1408_v21 = vand.u32 2147483648, %v2463_v4  ;;  %vm1402_vm5 = vweird.f32 %v2463_v4  ;;  %v1406_v15 = vand.u32 2147483647, %v2463_v4 }
 0x3ed   : > { %v1384_v31 = vsub.f32 1.0, %v1383_v49 }
 0x3ee   : > { %vm1407_vm7 = vcmp.eq.f32.partialorder %v1406_v15, 8.507059e+37 }
 0x3ef   : > { %v1385_v17 = vmul.f32 %v1730_v54, %v1384_v31 }
 0x3f0   : > { %v1181_v14 = vpop.f32.mrf.mxu3 }
 0x3f1   : > { %v1291_v7 = vmul.f32 %v1290_v11, %v1181_v14  ;;  %v1364_v14 = vor.u32 1.1754944e-38, %v1363_v48  ;;  %v1386_v20 = vadd.f32 %v1730_v54, %v1385_v17 }
 0x3f2   : > { %v1732_v40 = vpop.eup %1731 }
 0x3f3   : > { %1461 = vst.msk [vmem:[%s2397_s11 + $0x20] sm:$0xff] %vm306_vm0, %v1291_v7  ;;  %v1365_v47 = vsel %vm1362_vm10, %v1364_v14, %v1360_v53  ;;  %v2472_v7 = vpop.xlane.xlu0 %1049  ;;  %v1398_v24 = vmul.f32 %v1732_v40, %v2463_v4  ;;  %v1390_v13 = vsel %vm1389_vm2, %v1730_v54, %v1386_v20  ;;  %vm1403_vm4 = vweird.f32 %v1732_v40 }
 0x3f4   : > { %1733 = vrcp.f32 %v2472_v7  ;;  %vm1404_vm6 = vmor %vm1402_vm5, %vm1403_vm4  ;;  %v1423_v60 = vand.u32 2147483648, %v2472_v7  ;;  %vm1417_vm9 = vweird.f32 %v2472_v7  ;;  %v1421_v8 = vand.u32 2147483647, %v2472_v7 }
 0x3f5   : > { %v1399_v28 = vsub.f32 1.0, %v1398_v24 }
 0x3f6   : > { %v1424_v44 = vor.u32 1.1754944e-38, %v1423_v60  ;;  %vm1422_vm11 = vcmp.eq.f32.partialorder %v1421_v8, 8.507059e+37 }
 0x3f7   : > { %v1400_v51 = vmul.f32 %v1732_v40, %v1399_v28 }
 0x3f8   : > { %v1184_v3 = vpop.f32.mrf.mxu3 }
 0x3f9   : > { %v1306_v25 = vmul.f32 %v1305_v37, %v1184_v3  ;;  %v1379_v3 = vor.u32 1.1754944e-38, %v1378_v12  ;;  %v1401_v16 = vadd.f32 %v1732_v40, %v1400_v51 }
 0x3fa   : > { %v1734_v50 = vpop.eup %1733 }
 0x3fb   : > { %1462 = vst.msk [vmem:[%s2397_s11 + $0x28] sm:$0xff] %vm306_vm0, %v1306_v25  ;;  %v1380_v22 = vsel %vm1377_vm14, %v1379_v3, %v1375_v41  ;;  %v2481_v25 = vpop.xlane.xlu1 %1051  ;;  %v1413_v10 = vmul.f32 %v1734_v50, %v2472_v7  ;;  %v1405_v62 = vsel %vm1404_vm6, %v1732_v40, %v1401_v16  ;;  %vm1418_vm8 = vweird.f32 %v1734_v50 }
 0x3fc   : > { %1735 = vrcp.f32 %v2481_v25  ;;  %vm1419_vm10 = vmor %vm1417_vm9, %vm1418_vm8  ;;  %v1438_v18 = vand.u32 2147483648, %v2481_v25  ;;  %vm1432_vm13 = vweird.f32 %v2481_v25  ;;  %v1436_v54 = vand.u32 2147483647, %v2481_v25 }
 0x3fd   : > { %v1414_v58 = vsub.f32 1.0, %v1413_v10 }
 0x3fe   : > { %v1439_v49 = vor.u32 1.1754944e-38, %v1438_v18  ;;  %vm1437_vm15 = vcmp.eq.f32.partialorder %v1436_v54, 8.507059e+37 }
 0x3ff   : > { %v1415_v39 = vmul.f32 %v1734_v50, %v1414_v58 }
 0x400   : > { %v1187_v34 = vpop.f32.mrf.mxu3 }
 0x401   : > { %v1321_v56 = vmul.f32 %v1320_v30, %v1187_v34  ;;  %v1394_v34 = vor.u32 1.1754944e-38, %v1393_v46  ;;  %v1416_v38 = vadd.f32 %v1734_v50, %v1415_v39 }
 0x402   : > { %v1736_v6 = vpop.eup %1735 }
 0x403   : > { %1463 = vst.msk [vmem:[%s2397_s11 + $0x30] sm:$0xff] %vm306_vm0, %v1321_v56  ;;  %v1395_v19 = vsel %vm1392_vm3, %v1394_v34, %v1390_v13  ;;  %v1054_v56 = vpop.xlane.xlu0 %1053  ;;  %v1428_v61 = vmul.f32 %v1736_v6, %v2481_v25  ;;  %v1420_v5 = vsel %vm1419_vm10, %v1734_v50, %v1416_v38  ;;  %vm1433_vm12 = vweird.f32 %v1736_v6 }
 0x404   : > { %1737 = vrcp.f32 %v1054_v56  ;;  %vm1434_vm14 = vmor %vm1432_vm13, %vm1433_vm12  ;;  %vm1447_vm2 = vweird.f32 %v1054_v56  ;;  %v1451_v31 = vand.u32 2147483647, %v1054_v56 }
 0x405   : > { %v1429_v52 = vsub.f32 1.0, %v1428_v61 }
 0x406   : > { %vm1452_vm4 = vcmp.eq.f32.partialorder %v1451_v31, 8.507059e+37 }
 0x407   : > { %v1430_v63 = vmul.f32 %v1736_v6, %v1429_v52 }
 0x408   : > { %v1190_v57 = vpop.f32.mrf.mxu3 }
 0x409   : > { %v1336_v1 = vmul.f32 %v1335_v43, %v1190_v57  ;;  %v1409_v57 = vor.u32 1.1754944e-38, %v1408_v21 }
 0x40a   : > { %v1738_v9 = vpop.eup %1737 }
 0x40b   : > { %1464 = vst.msk [vmem:[%s2397_s11 + $0x38] sm:$0xff] %vm306_vm0, %v1336_v1  ;;  %v1410_v42 = vsel %vm1407_vm7, %v1409_v57, %v1405_v62  ;;  %v1443_v35 = vmul.f32 %v1738_v9, %v1054_v56  ;;  %vm1448_vm1 = vweird.f32 %v1738_v9 }
 0x40c   : > { %vm1449_vm3 = vmor %vm1447_vm2, %vm1448_vm1 }
 0x40d   : > { %v1444_v32 = vsub.f32 1.0, %v1443_v35 }
 0x40f   : > { %v1445_v48 = vmul.f32 %v1738_v9, %v1444_v32 }
 0x410   : > { %v1193_v36 = vpop.f32.mrf.mxu3 }
 0x411   : > { %v1351_v59 = vmul.f32 %v1350_v0, %v1193_v36  ;;  %v1425_v0 = vsel %vm1422_vm11, %v1424_v44, %v1420_v5 }
 0x413   : > { %1465 = vst.msk [vmem:[%s2397_s11 + $0x40] sm:$0xff] %vm306_vm0, %v1351_v59  ;;  %v1431_v59 = vadd.f32 %v1736_v6, %v1430_v63 }
 0x415   : > { %v1435_v45 = vsel %vm1434_vm14, %v1736_v6, %v1431_v59 }
 0x416   : > { %v1440_v55 = vsel %vm1437_vm15, %v1439_v49, %v1435_v45 }
 0x418   : > { %v1196_v11 = vpop.f32.mrf.mxu3 }
 0x419   : > { %v1366_v2 = vmul.f32 %v1365_v47, %v1196_v11  ;;  %v1446_v11 = vadd.f32 %v1738_v9, %v1445_v48  ;;  %v1453_v47 = vand.u32 2147483648, %v1054_v56 }
 0x41b   : > { %1466 = vst.msk [vmem:[%s2397_s11 + $0x48] sm:$0xff] %vm306_vm0, %v1366_v2  ;;  %v1450_v7 = vsel %vm1449_vm3, %v1738_v9, %v1446_v11  ;;  %v1454_v2 = vor.u32 1.1754944e-38, %v1453_v47 }
 0x41d   : > { %v1455_v40 = vsel %vm1452_vm4, %v1454_v2, %v1450_v7 }
 0x420   : > { %v1199_v37 = vpop.f32.mrf.mxu3 }
 0x421   : > { %v1381_v33 = vmul.f32 %v1380_v22, %v1199_v37 }
 0x423   : > { %1467 = vst.msk [vmem:[%s2397_s11 + $0x50] sm:$0xff] %vm306_vm0, %v1381_v33 }
 0x428   : > { %v1202_v30 = vpop.f32.mrf.mxu3 }
 0x429   : > { %v1396_v29 = vmul.f32 %v1395_v19, %v1202_v30 }
 0x42b   : > { %1468 = vst.msk [vmem:[%s2397_s11 + $0x58] sm:$0xff] %vm306_vm0, %v1396_v29 }
 0x430   : > { %v1205_v43 = vpop.f32.mrf.mxu3 }
 0x431   : > { %v1411_v1 = vmul.f32 %v1410_v42, %v1205_v43 }
 0x433   : > { %1469 = vst.msk [vmem:[%s2397_s11 + $0x60] sm:$0xff] %vm306_vm0, %v1411_v1 }
 0x438   : > { %v1208_v36 = vpop.f32.mrf.mxu3 }
 0x439   : > { %v1426_v4 = vmul.f32 %v1425_v0, %v1208_v36 }
 0x43b   : > { %1470 = vst.msk [vmem:[%s2397_s11 + $0x68] sm:$0xff] %vm306_vm0, %v1426_v4 }
 0x440   : > { %v1211_v53 = vpop.f32.mrf.mxu3 }
 0x441   : > { %v1441_v14 = vmul.f32 %v1440_v55, %v1211_v53 }
 0x443   : > { %1471 = vst.msk [vmem:[%s2397_s11 + $0x70] sm:$0xff] %vm306_vm0, %v1441_v14 }
 0x448   : > { %v1214_v27 = vpop.f32.mrf.mxu3 }
 0x449   : > { %v1456_v12 = vmul.f32 %v1455_v40, %v1214_v27 }
 0x44b   : > { %1472 = vst.msk [vmem:[%s2397_s11 + $0x78] sm:$0xff] %vm306_vm0, %v1456_v12 }
 0x44c PF: > { %s14_s15 = sadd.s32 1, %s1745_s15  }
 0x44d   : > { %p11_p4 = scmp.ge.s32.totalorder %s14_s15, 10  }
 0x44f   :  { %13 = sbr.rel (!%p11_p4) target bundleno = 1 (0x1), region = 72 }

</bundles_post_ra>
